<compile_context>
chip_gen: v5e
topology: v5e:2x2
jax: 0.10.0
libtpu: 0.0.40
codegen_flags: <defaults>
</compile_context>

<pallas_src>
import math

import jax
import jax.numpy as jnp
import numpy as np
from jax import lax
from jax.experimental import pallas as pl
from jax.experimental.pallas import tpu as pltpu

_SUBLANE = 8
_LANES = 128
_STATIC_UNROLL_MAX_T = 16    # fully unroll the time loop up to this seq length


# ---------------------------------------------------------------------------
# LSTM cell (single-tanh gate trick)
# ---------------------------------------------------------------------------
def _lstm_cell(gx_t, h, c, whh, H):
    """One LSTM step.  `gx_t` already holds x@W_ih^T + b with the i/f/o gate
    columns pre-scaled by 0.5 (wrapper-side), so a single full-vreg tanh gives
    every gate:  sigmoid(z) = 0.5*(tanh(z/2)+1) for i/f/o,  tanh(z) for g."""
    gates = gx_t + jnp.dot(h, whh, preferred_element_type=jnp.float32)  # (BP,4H)
    t = jnp.tanh(gates)            # ONE EUP push for all four gates
    s = 0.5 * t + 0.5              # sigmoid of the pre-halved i/f/o lanes (VPU)
    i_g = s[:, 0:H]
    f_g = s[:, H:2 * H]
    g_g = t[:, 2 * H:3 * H]
    o_g = s[:, 3 * H:4 * H]
    c_new = f_g * c + i_g * g_g
    h_new = o_g * jnp.tanh(c_new)  # second (quarter-vreg) EUP push
    return h_new, c_new


# ---------------------------------------------------------------------------
# Fused Pallas kernel (built per static config)
# ---------------------------------------------------------------------------
def _make_fused_lstm_kernel(num_layers, T, BP, H):
    unroll_time = T <= _STATIC_UNROLL_MAX_T

    def kernel(*refs):
        # refs = [x2d, (wih, whh, b) * L, fc_w, fc_b, out, gx_scr, hseq_scr]
        x_ref = refs[0]
        fcw_ref = refs[1 + 3 * num_layers]
        fcb_ref = refs[2 + 3 * num_layers]
        out_ref = refs[3 + 3 * num_layers]
        gx_scr = refs[4 + 3 * num_layers]
        hseq_scr = refs[5 + 3 * num_layers]

        h = None
        for l in range(num_layers):
            wih = refs[1 + 3 * l][...]   # (In_l, 4H), resident in VMEM
            whh = refs[2 + 3 * l][...]   # (H,    4H)
            b = refs[3 + 3 * l][...]     # (1,    4H) = b_ih+b_hh (i/f/o halved)

            # Batched input projection for ALL timesteps of this layer: one
            # (T*BP, In_l) @ (In_l, 4H) MXU matmul, off the serial path.
            # TODO(synk): cast matmul operands to bf16 (keep f32 accumulation)
            # for ~3x fewer MXU passes; breaks 1e-5 PyTorch parity (~1e-2).
            inp = x_ref[...] if l == 0 else hseq_scr[...]
            gx = jnp.dot(inp, wih, preferred_element_type=jnp.float32) + b

            h = jnp.zeros((BP, H), jnp.float32)
            c = jnp.zeros((BP, H), jnp.float32)
            last = (l == num_layers - 1)

            if unroll_time:
                # Small T: static unroll -- h/c and gx live in vregs and the
                # scheduler sees the whole dependence chain.
                for t in range(T):
                    h, c = _lstm_cell(gx[t * BP:(t + 1) * BP, :], h, c, whh, H)
                    if not last:
                        # Aligned 8-sublane store for the next layer's batched matmul.
                        hseq_scr[pl.ds(t * BP, BP), :] = h
            else:
                # Large T: stage gx in VMEM and stream the (BP, 4H) slice per
                # step, bounding vreg live ranges.
                gx_scr[...] = gx

                def body(t, carry):
                    h_t, c_t = carry
                    base = pl.multiple_of(t * BP, BP)
                    g_t = gx_scr[pl.ds(base, BP), :]
                    h_n, c_n = _lstm_cell(g_t, h_t, c_t, whh, H)
                    if not last:
                        hseq_scr[pl.ds(base, BP), :] = h_n
                    return (h_n, c_n)

                h, c = lax.fori_loop(0, T, body, (h, c),
                                     unroll=4 if T % 4 == 0 else 1)

        # Final Linear fused in; fc output columns were zero-padded to a full
        # 128-lane slab wrapper-side, so this store is lane-dense (unmasked).
        out_ref[...] = (jnp.dot(h, fcw_ref[...],
                                preferred_element_type=jnp.float32)
                        + fcb_ref[...])

    return kernel


# ---------------------------------------------------------------------------
# Wrapper: layout plumbing + pallas_call
# ---------------------------------------------------------------------------
@jax.jit
def lstm_forward(x, params):
    """x: (batch, seq, input_size) -> (batch, output_size)."""
    B, T, In = x.shape
    H = params["layers"][0][1].shape[1]          # w_hh: (4H, H)
    O = params["fc_w"].shape[0]
    L = len(params["layers"])
    BP = ((B + _SUBLANE - 1) // _SUBLANE) * _SUBLANE   # pad batch to sublanes
    OP = ((O + _LANES - 1) // _LANES) * _LANES         # pad fc out to lanes

    # Gate-column scale: halve i/f/o so sigmoid(z) = 0.5*(tanh(z_scaled)+1);
    # g stays unscaled (needs tanh(z)).  A column transform is free at MXU time.
    gate_scale = jnp.concatenate([
        jnp.full((H,), 0.5, jnp.float32),
        jnp.full((H,), 0.5, jnp.float32),
        jnp.ones((H,), jnp.float32),
        jnp.full((H,), 0.5, jnp.float32)])

    # batch_first -> time-major, pad batch to BP, flatten to a lane/sublane
    # friendly (T*BP, In) slab (all outside the kernel).
    x_tm = jnp.transpose(x, (1, 0, 2)).astype(jnp.float32)      # (T, B, In)
    x_tm = jnp.pad(x_tm, ((0, 0), (0, BP - B), (0, 0)))         # (T, BP, In)
    x2d = x_tm.reshape(T * BP, In)

    flat_inputs = [x2d]
    for (w_ih, w_hh, b_ih, b_hh) in params["layers"]:
        flat_inputs.append(w_ih.astype(jnp.float32).T * gate_scale[None, :])
        flat_inputs.append(w_hh.astype(jnp.float32).T * gate_scale[None, :])
        flat_inputs.append(((b_ih + b_hh).astype(jnp.float32)
                            * gate_scale)[None, :])
    fc_w_t = jnp.zeros((H, OP), jnp.float32).at[:, :O].set(
        params["fc_w"].astype(jnp.float32).T)
    fc_b = jnp.zeros((1, OP), jnp.float32).at[0, :O].set(
        params["fc_b"].astype(jnp.float32))
    flat_inputs += [fc_w_t, fc_b]

    # Everything-resident VMEM budget (+ headroom for compiler temporaries).
    est = sum(int(np.prod(a.shape)) * 4 for a in flat_inputs)
    est += BP * OP * 4 + T * BP * (4 * H + H) * 4          # out + scratches
    vmem_limit = int(min(64 * 2 ** 20, max(3 * est, 16 * 2 ** 20)))

    kernel = _make_fused_lstm_kernel(L, T, BP, H)
    # TODO(synk): for B >= 16 on v7x, add a leading "parallel" batch grid axis
    # (dimension_semantics) to use the 2nd TensorCore; and once H/T exceed the
    # VMEM budget, add an "arbitrary" layer axis so layer l+1 weights stream
    # behind layer l's recurrence.
    out = pl.pallas_call(
        kernel,
        out_shape=jax.ShapeDtypeStruct((BP, OP), jnp.float32),
        # Single invocation (no grid): every operand whole-array in VMEM.
        in_specs=[pl.BlockSpec(memory_space=pltpu.MemorySpace.VMEM)]
                 * len(flat_inputs),
        out_specs=pl.BlockSpec(memory_space=pltpu.MemorySpace.VMEM),
        scratch_shapes=[pltpu.VMEM((T * BP, 4 * H), jnp.float32),   # gx stage
                        pltpu.VMEM((T * BP, H), jnp.float32)],      # inter-layer h
        compiler_params=pltpu.CompilerParams(vmem_limit_bytes=vmem_limit),
    )(*flat_inputs)
    return out[:B, :O]


# ---------------------------------------------------------------------------
# Deterministic parameter init (mirrors nn.LSTM / nn.Linear, canonical layout)
# ---------------------------------------------------------------------------
def init_params(key, input_size, hidden_size, num_layers, output_size):
    k = 1.0 / math.sqrt(hidden_size)
    layers = []
    for layer in range(num_layers):
        in_sz = input_size if layer == 0 else hidden_size
        key, k1, k2, k3, k4 = jax.random.split(key, 5)
        w_ih = jax.random.uniform(k1, (4 * hidden_size, in_sz), jnp.float32, -k, k)
        w_hh = jax.random.uniform(k2, (4 * hidden_size, hidden_size), jnp.float32, -k, k)
        b_ih = jax.random.uniform(k3, (4 * hidden_size,), jnp.float32, -k, k)
        b_hh = jax.random.uniform(k4, (4 * hidden_size,), jnp.float32, -k, k)
        layers.append((w_ih, w_hh, b_ih, b_hh))
    key, k5, k6 = jax.random.split(key, 3)
    fc_w = jax.random.uniform(k5, (output_size, hidden_size), jnp.float32, -k, k)
    fc_b = jax.random.uniform(k6, (output_size,), jnp.float32, -k, k)
    return {"layers": layers, "fc_w": fc_w, "fc_b": fc_b}


# ---------------------------------------------------------------------------
# Pure-JAX reference (canonical PyTorch math, for the correctness check)
# ---------------------------------------------------------------------------
def lstm_ref(x, params):
    h_seq = jnp.transpose(x, (1, 0, 2)).astype(jnp.float32)     # (T, B, In)
    for (w_ih, w_hh, b_ih, b_hh) in params["layers"]:
        H = w_hh.shape[1]
        B = h_seq.shape[1]

        def step(carry, xt, w_ih=w_ih, w_hh=w_hh, b_ih=b_ih, b_hh=b_hh, H=H):
            h, c = carry
            g = xt @ w_ih.T + h @ w_hh.T + b_ih + b_hh
            i = jax.nn.sigmoid(g[:, 0:H])
            f = jax.nn.sigmoid(g[:, H:2 * H])
            gg = jnp.tanh(g[:, 2 * H:3 * H])
            o = jax.nn.sigmoid(g[:, 3 * H:4 * H])
            c = f * c + i * gg
            h = o * jnp.tanh(c)
            return (h, c), h

        init = (jnp.zeros((B, H), jnp.float32), jnp.zeros((B, H), jnp.float32))
        _, h_seq = lax.scan(step, init, h_seq)
    return h_seq[-1] @ params["fc_w"].T + params["fc_b"]


# ---------------------------------------------------------------------------
if __name__ == "__main__":
    config = dict(input_size=8, hidden_size=32, num_layers=2, output_size=1)
    batch, seq = 2, 8

    key = jax.random.PRNGKey(0)
    key, kx = jax.random.split(key)
    x = jax.random.normal(kx, (batch, seq, config["input_size"]), jnp.float32)

    params = init_params(key, config["input_size"], config["hidden_size"],
                         config["num_layers"], config["output_size"])

    out = jax.block_until_ready(lstm_forward(x, params))
    ref = jax.block_until_ready(lstm_ref(x, params))

    assert out.shape == (batch, config["output_size"])
    np.testing.assert_allclose(np.asarray(out), np.asarray(ref),
                               rtol=1e-4, atol=1e-4)
    print("KERNEL_OK")
</pallas_src>

<mosaic_0001>
module attributes {stable_mosaic.version = 11 : i64} {
  func.func @kernel(%arg0: memref<64x8xf32, #tpu.memory_space<vmem>>, %arg1: memref<8x128xf32, #tpu.memory_space<vmem>>, %arg2: memref<32x128xf32, #tpu.memory_space<vmem>>, %arg3: memref<1x128xf32, #tpu.memory_space<vmem>>, %arg4: memref<32x128xf32, #tpu.memory_space<vmem>>, %arg5: memref<32x128xf32, #tpu.memory_space<vmem>>, %arg6: memref<1x128xf32, #tpu.memory_space<vmem>>, %arg7: memref<32x128xf32, #tpu.memory_space<vmem>>, %arg8: memref<1x128xf32, #tpu.memory_space<vmem>>, %arg9: memref<8x128xf32, #tpu.memory_space<vmem>>, %arg10: memref<64x128xf32, #tpu.memory_space<vmem>>, %arg11: memref<64x32xf32, #tpu.memory_space<vmem>>) attributes {dimension_semantics = [], scalar_prefetch = 0 : i64, scratch_operands = 2 : i64, tpu.core_type = #tpu.core_type<tc>} {
    %c0 = arith.constant 0 : index
    %c0_0 = arith.constant 0 : index
    %0 = vector.load %arg1[%c0, %c0_0] : memref<8x128xf32, #tpu.memory_space<vmem>>, vector<8x128xf32>
    %c0_1 = arith.constant 0 : index
    %c0_2 = arith.constant 0 : index
    %1 = vector.load %arg2[%c0_1, %c0_2] : memref<32x128xf32, #tpu.memory_space<vmem>>, vector<32x128xf32>
    %c0_3 = arith.constant 0 : index
    %c0_4 = arith.constant 0 : index
    %2 = vector.load %arg3[%c0_3, %c0_4] : memref<1x128xf32, #tpu.memory_space<vmem>>, vector<1x128xf32>
    %c0_5 = arith.constant 0 : index
    %c0_6 = arith.constant 0 : index
    %3 = vector.load %arg0[%c0_5, %c0_6] : memref<64x8xf32, #tpu.memory_space<vmem>>, vector<64x8xf32>
    %cst = arith.constant dense<0.000000e+00> : vector<64x128xf32>
    %4 = tpu.matmul %3, %0, %cst {dimension_numbers = #tpu.dot_dimension_numbers<[1], [0], [0], [1], [0, 0, 1, 1], [], []>} : vector<64x8xf32>, vector<8x128xf32>, vector<64x128xf32> -> vector<64x128xf32>
    %5 = vector.broadcast %2 : vector<1x128xf32> to vector<64x128xf32>
    %6 = arith.addf %4, %5 : vector<64x128xf32>
    %cst_7 = arith.constant 0.000000e+00 : f32
    %7 = vector.broadcast %cst_7 : f32 to vector<8x32xf32>
    %cst_8 = arith.constant 0.000000e+00 : f32
    %8 = vector.broadcast %cst_8 : f32 to vector<8x32xf32>
    %9 = vector.extract_strided_slice %6 {offsets = [0, 0], sizes = [8, 128], strides = [1, 1]} : vector<64x128xf32> to vector<8x128xf32>
    %cst_9 = arith.constant dense<0.000000e+00> : vector<8x128xf32>
    %10 = tpu.matmul %7, %1, %cst_9 {dimension_numbers = #tpu.dot_dimension_numbers<[1], [0], [0], [1], [0, 0, 1, 1], [], []>} : vector<8x32xf32>, vector<32x128xf32>, vector<8x128xf32> -> vector<8x128xf32>
    %11 = arith.addf %9, %10 : vector<8x128xf32>
    %12 = math.tanh %11 : vector<8x128xf32>
    %cst_10 = arith.constant 5.000000e-01 : f32
    %13 = vector.broadcast %cst_10 : f32 to vector<8x128xf32>
    %14 = arith.mulf %13, %12 : vector<8x128xf32>
    %cst_11 = arith.constant 5.000000e-01 : f32
    %15 = vector.broadcast %cst_11 : f32 to vector<8x128xf32>
    %16 = arith.addf %14, %15 : vector<8x128xf32>
    %17 = vector.extract_strided_slice %16 {offsets = [0, 0], sizes = [8, 32], strides = [1, 1]} : vector<8x128xf32> to vector<8x32xf32>
    %18 = vector.extract_strided_slice %16 {offsets = [0, 32], sizes = [8, 32], strides = [1, 1]} : vector<8x128xf32> to vector<8x32xf32>
    %19 = vector.extract_strided_slice %12 {offsets = [0, 64], sizes = [8, 32], strides = [1, 1]} : vector<8x128xf32> to vector<8x32xf32>
    %20 = vector.extract_strided_slice %16 {offsets = [0, 96], sizes = [8, 32], strides = [1, 1]} : vector<8x128xf32> to vector<8x32xf32>
    %21 = arith.mulf %18, %8 : vector<8x32xf32>
    %22 = arith.mulf %17, %19 : vector<8x32xf32>
    %23 = arith.addf %21, %22 : vector<8x32xf32>
    %24 = math.tanh %23 : vector<8x32xf32>
    %25 = arith.mulf %20, %24 : vector<8x32xf32>
    %c0_12 = arith.constant 0 : index
    %c0_13 = arith.constant 0 : index
    %26 = vector.load %arg11[%c0_12, %c0_13] : memref<64x32xf32, #tpu.memory_space<vmem>>, vector<8x32xf32>
    tpu.vector_store %arg11[%c0_12, %c0_13], %25 {strides = array<i32>} : memref<64x32xf32, #tpu.memory_space<vmem>>, vector<8x32xf32>,
    %27 = vector.extract_strided_slice %6 {offsets = [8, 0], sizes = [8, 128], strides = [1, 1]} : vector<64x128xf32> to vector<8x128xf32>
    %cst_14 = arith.constant dense<0.000000e+00> : vector<8x128xf32>
    %28 = tpu.matmul %25, %1, %cst_14 {dimension_numbers = #tpu.dot_dimension_numbers<[1], [0], [0], [1], [0, 0, 1, 1], [], []>} : vector<8x32xf32>, vector<32x128xf32>, vector<8x128xf32> -> vector<8x128xf32>
    %29 = arith.addf %27, %28 : vector<8x128xf32>
    %30 = math.tanh %29 : vector<8x128xf32>
    %cst_15 = arith.constant 5.000000e-01 : f32
    %31 = vector.broadcast %cst_15 : f32 to vector<8x128xf32>
    %32 = arith.mulf %31, %30 : vector<8x128xf32>
    %cst_16 = arith.constant 5.000000e-01 : f32
    %33 = vector.broadcast %cst_16 : f32 to vector<8x128xf32>
    %34 = arith.addf %32, %33 : vector<8x128xf32>
    %35 = vector.extract_strided_slice %34 {offsets = [0, 0], sizes = [8, 32], strides = [1, 1]} : vector<8x128xf32> to vector<8x32xf32>
    %36 = vector.extract_strided_slice %34 {offsets = [0, 32], sizes = [8, 32], strides = [1, 1]} : vector<8x128xf32> to vector<8x32xf32>
    %37 = vector.extract_strided_slice %30 {offsets = [0, 64], sizes = [8, 32], strides = [1, 1]} : vector<8x128xf32> to vector<8x32xf32>
    %38 = vector.extract_strided_slice %34 {offsets = [0, 96], sizes = [8, 32], strides = [1, 1]} : vector<8x128xf32> to vector<8x32xf32>
    %39 = arith.mulf %36, %23 : vector<8x32xf32>
    %40 = arith.mulf %35, %37 : vector<8x32xf32>
    %41 = arith.addf %39, %40 : vector<8x32xf32>
    %42 = math.tanh %41 : vector<8x32xf32>
    %43 = arith.mulf %38, %42 : vector<8x32xf32>
    %c8 = arith.constant 8 : index
    %c0_17 = arith.constant 0 : index
    %44 = vector.load %arg11[%c8, %c0_17] : memref<64x32xf32, #tpu.memory_space<vmem>>, vector<8x32xf32>
    tpu.vector_store %arg11[%c8, %c0_17], %43 {strides = array<i32>} : memref<64x32xf32, #tpu.memory_space<vmem>>, vector<8x32xf32>,
    %45 = vector.extract_strided_slice %6 {offsets = [16, 0], sizes = [8, 128], strides = [1, 1]} : vector<64x128xf32> to vector<8x128xf32>
    %cst_18 = arith.constant dense<0.000000e+00> : vector<8x128xf32>
    %46 = tpu.matmul %43, %1, %cst_18 {dimension_numbers = #tpu.dot_dimension_numbers<[1], [0], [0], [1], [0, 0, 1, 1], [], []>} : vector<8x32xf32>, vector<32x128xf32>, vector<8x128xf32> -> vector<8x128xf32>
    %47 = arith.addf %45, %46 : vector<8x128xf32>
    %48 = math.tanh %47 : vector<8x128xf32>
    %cst_19 = arith.constant 5.000000e-01 : f32
    %49 = vector.broadcast %cst_19 : f32 to vector<8x128xf32>
    %50 = arith.mulf %49, %48 : vector<8x128xf32>
    %cst_20 = arith.constant 5.000000e-01 : f32
    %51 = vector.broadcast %cst_20 : f32 to vector<8x128xf32>
    %52 = arith.addf %50, %51 : vector<8x128xf32>
    %53 = vector.extract_strided_slice %52 {offsets = [0, 0], sizes = [8, 32], strides = [1, 1]} : vector<8x128xf32> to vector<8x32xf32>
    %54 = vector.extract_strided_slice %52 {offsets = [0, 32], sizes = [8, 32], strides = [1, 1]} : vector<8x128xf32> to vector<8x32xf32>
    %55 = vector.extract_strided_slice %48 {offsets = [0, 64], sizes = [8, 32], strides = [1, 1]} : vector<8x128xf32> to vector<8x32xf32>
    %56 = vector.extract_strided_slice %52 {offsets = [0, 96], sizes = [8, 32], strides = [1, 1]} : vector<8x128xf32> to vector<8x32xf32>
    %57 = arith.mulf %54, %41 : vector<8x32xf32>
    %58 = arith.mulf %53, %55 : vector<8x32xf32>
    %59 = arith.addf %57, %58 : vector<8x32xf32>
    %60 = math.tanh %59 : vector<8x32xf32>
    %61 = arith.mulf %56, %60 : vector<8x32xf32>
    %c16 = arith.constant 16 : index
    %c0_21 = arith.constant 0 : index
    %62 = vector.load %arg11[%c16, %c0_21] : memref<64x32xf32, #tpu.memory_space<vmem>>, vector<8x32xf32>
    tpu.vector_store %arg11[%c16, %c0_21], %61 {strides = array<i32>} : memref<64x32xf32, #tpu.memory_space<vmem>>, vector<8x32xf32>,
    %63 = vector.extract_strided_slice %6 {offsets = [24, 0], sizes = [8, 128], strides = [1, 1]} : vector<64x128xf32> to vector<8x128xf32>
    %cst_22 = arith.constant dense<0.000000e+00> : vector<8x128xf32>
    %64 = tpu.matmul %61, %1, %cst_22 {dimension_numbers = #tpu.dot_dimension_numbers<[1], [0], [0], [1], [0, 0, 1, 1], [], []>} : vector<8x32xf32>, vector<32x128xf32>, vector<8x128xf32> -> vector<8x128xf32>
    %65 = arith.addf %63, %64 : vector<8x128xf32>
    %66 = math.tanh %65 : vector<8x128xf32>
    %cst_23 = arith.constant 5.000000e-01 : f32
    %67 = vector.broadcast %cst_23 : f32 to vector<8x128xf32>
    %68 = arith.mulf %67, %66 : vector<8x128xf32>
    %cst_24 = arith.constant 5.000000e-01 : f32
    %69 = vector.broadcast %cst_24 : f32 to vector<8x128xf32>
    %70 = arith.addf %68, %69 : vector<8x128xf32>
    %71 = vector.extract_strided_slice %70 {offsets = [0, 0], sizes = [8, 32], strides = [1, 1]} : vector<8x128xf32> to vector<8x32xf32>
    %72 = vector.extract_strided_slice %70 {offsets = [0, 32], sizes = [8, 32], strides = [1, 1]} : vector<8x128xf32> to vector<8x32xf32>
    %73 = vector.extract_strided_slice %66 {offsets = [0, 64], sizes = [8, 32], strides = [1, 1]} : vector<8x128xf32> to vector<8x32xf32>
    %74 = vector.extract_strided_slice %70 {offsets = [0, 96], sizes = [8, 32], strides = [1, 1]} : vector<8x128xf32> to vector<8x32xf32>
    %75 = arith.mulf %72, %59 : vector<8x32xf32>
    %76 = arith.mulf %71, %73 : vector<8x32xf32>
    %77 = arith.addf %75, %76 : vector<8x32xf32>
    %78 = math.tanh %77 : vector<8x32xf32>
    %79 = arith.mulf %74, %78 : vector<8x32xf32>
    %c24 = arith.constant 24 : index
    %c0_25 = arith.constant 0 : index
    %80 = vector.load %arg11[%c24, %c0_25] : memref<64x32xf32, #tpu.memory_space<vmem>>, vector<8x32xf32>
    tpu.vector_store %arg11[%c24, %c0_25], %79 {strides = array<i32>} : memref<64x32xf32, #tpu.memory_space<vmem>>, vector<8x32xf32>,
    %81 = vector.extract_strided_slice %6 {offsets = [32, 0], sizes = [8, 128], strides = [1, 1]} : vector<64x128xf32> to vector<8x128xf32>
    %cst_26 = arith.constant dense<0.000000e+00> : vector<8x128xf32>
    %82 = tpu.matmul %79, %1, %cst_26 {dimension_numbers = #tpu.dot_dimension_numbers<[1], [0], [0], [1], [0, 0, 1, 1], [], []>} : vector<8x32xf32>, vector<32x128xf32>, vector<8x128xf32> -> vector<8x128xf32>
    %83 = arith.addf %81, %82 : vector<8x128xf32>
    %84 = math.tanh %83 : vector<8x128xf32>
    %cst_27 = arith.constant 5.000000e-01 : f32
    %85 = vector.broadcast %cst_27 : f32 to vector<8x128xf32>
    %86 = arith.mulf %85, %84 : vector<8x128xf32>
    %cst_28 = arith.constant 5.000000e-01 : f32
    %87 = vector.broadcast %cst_28 : f32 to vector<8x128xf32>
    %88 = arith.addf %86, %87 : vector<8x128xf32>
    %89 = vector.extract_strided_slice %88 {offsets = [0, 0], sizes = [8, 32], strides = [1, 1]} : vector<8x128xf32> to vector<8x32xf32>
    %90 = vector.extract_strided_slice %88 {offsets = [0, 32], sizes = [8, 32], strides = [1, 1]} : vector<8x128xf32> to vector<8x32xf32>
    %91 = vector.extract_strided_slice %84 {offsets = [0, 64], sizes = [8, 32], strides = [1, 1]} : vector<8x128xf32> to vector<8x32xf32>
    %92 = vector.extract_strided_slice %88 {offsets = [0, 96], sizes = [8, 32], strides = [1, 1]} : vector<8x128xf32> to vector<8x32xf32>
    %93 = arith.mulf %90, %77 : vector<8x32xf32>
    %94 = arith.mulf %89, %91 : vector<8x32xf32>
    %95 = arith.addf %93, %94 : vector<8x32xf32>
    %96 = math.tanh %95 : vector<8x32xf32>
    %97 = arith.mulf %92, %96 : vector<8x32xf32>
    %c32 = arith.constant 32 : index
    %c0_29 = arith.constant 0 : index
    %98 = vector.load %arg11[%c32, %c0_29] : memref<64x32xf32, #tpu.memory_space<vmem>>, vector<8x32xf32>
    tpu.vector_store %arg11[%c32, %c0_29], %97 {strides = array<i32>} : memref<64x32xf32, #tpu.memory_space<vmem>>, vector<8x32xf32>,
    %99 = vector.extract_strided_slice %6 {offsets = [40, 0], sizes = [8, 128], strides = [1, 1]} : vector<64x128xf32> to vector<8x128xf32>
    %cst_30 = arith.constant dense<0.000000e+00> : vector<8x128xf32>
    %100 = tpu.matmul %97, %1, %cst_30 {dimension_numbers = #tpu.dot_dimension_numbers<[1], [0], [0], [1], [0, 0, 1, 1], [], []>} : vector<8x32xf32>, vector<32x128xf32>, vector<8x128xf32> -> vector<8x128xf32>
    %101 = arith.addf %99, %100 : vector<8x128xf32>
    %102 = math.tanh %101 : vector<8x128xf32>
    %cst_31 = arith.constant 5.000000e-01 : f32
    %103 = vector.broadcast %cst_31 : f32 to vector<8x128xf32>
    %104 = arith.mulf %103, %102 : vector<8x128xf32>
    %cst_32 = arith.constant 5.000000e-01 : f32
    %105 = vector.broadcast %cst_32 : f32 to vector<8x128xf32>
    %106 = arith.addf %104, %105 : vector<8x128xf32>
    %107 = vector.extract_strided_slice %106 {offsets = [0, 0], sizes = [8, 32], strides = [1, 1]} : vector<8x128xf32> to vector<8x32xf32>
    %108 = vector.extract_strided_slice %106 {offsets = [0, 32], sizes = [8, 32], strides = [1, 1]} : vector<8x128xf32> to vector<8x32xf32>
    %109 = vector.extract_strided_slice %102 {offsets = [0, 64], sizes = [8, 32], strides = [1, 1]} : vector<8x128xf32> to vector<8x32xf32>
    %110 = vector.extract_strided_slice %106 {offsets = [0, 96], sizes = [8, 32], strides = [1, 1]} : vector<8x128xf32> to vector<8x32xf32>
    %111 = arith.mulf %108, %95 : vector<8x32xf32>
    %112 = arith.mulf %107, %109 : vector<8x32xf32>
    %113 = arith.addf %111, %112 : vector<8x32xf32>
    %114 = math.tanh %113 : vector<8x32xf32>
    %115 = arith.mulf %110, %114 : vector<8x32xf32>
    %c40 = arith.constant 40 : index
    %c0_33 = arith.constant 0 : index
    %116 = vector.load %arg11[%c40, %c0_33] : memref<64x32xf32, #tpu.memory_space<vmem>>, vector<8x32xf32>
    tpu.vector_store %arg11[%c40, %c0_33], %115 {strides = array<i32>} : memref<64x32xf32, #tpu.memory_space<vmem>>, vector<8x32xf32>,
    %117 = vector.extract_strided_slice %6 {offsets = [48, 0], sizes = [8, 128], strides = [1, 1]} : vector<64x128xf32> to vector<8x128xf32>
    %cst_34 = arith.constant dense<0.000000e+00> : vector<8x128xf32>
    %118 = tpu.matmul %115, %1, %cst_34 {dimension_numbers = #tpu.dot_dimension_numbers<[1], [0], [0], [1], [0, 0, 1, 1], [], []>} : vector<8x32xf32>, vector<32x128xf32>, vector<8x128xf32> -> vector<8x128xf32>
    %119 = arith.addf %117, %118 : vector<8x128xf32>
    %120 = math.tanh %119 : vector<8x128xf32>
    %cst_35 = arith.constant 5.000000e-01 : f32
    %121 = vector.broadcast %cst_35 : f32 to vector<8x128xf32>
    %122 = arith.mulf %121, %120 : vector<8x128xf32>
    %cst_36 = arith.constant 5.000000e-01 : f32
    %123 = vector.broadcast %cst_36 : f32 to vector<8x128xf32>
    %124 = arith.addf %122, %123 : vector<8x128xf32>
    %125 = vector.extract_strided_slice %124 {offsets = [0, 0], sizes = [8, 32], strides = [1, 1]} : vector<8x128xf32> to vector<8x32xf32>
    %126 = vector.extract_strided_slice %124 {offsets = [0, 32], sizes = [8, 32], strides = [1, 1]} : vector<8x128xf32> to vector<8x32xf32>
    %127 = vector.extract_strided_slice %120 {offsets = [0, 64], sizes = [8, 32], strides = [1, 1]} : vector<8x128xf32> to vector<8x32xf32>
    %128 = vector.extract_strided_slice %124 {offsets = [0, 96], sizes = [8, 32], strides = [1, 1]} : vector<8x128xf32> to vector<8x32xf32>
    %129 = arith.mulf %126, %113 : vector<8x32xf32>
    %130 = arith.mulf %125, %127 : vector<8x32xf32>
    %131 = arith.addf %129, %130 : vector<8x32xf32>
    %132 = math.tanh %131 : vector<8x32xf32>
    %133 = arith.mulf %128, %132 : vector<8x32xf32>
    %c48 = arith.constant 48 : index
    %c0_37 = arith.constant 0 : index
    %134 = vector.load %arg11[%c48, %c0_37] : memref<64x32xf32, #tpu.memory_space<vmem>>, vector<8x32xf32>
    tpu.vector_store %arg11[%c48, %c0_37], %133 {strides = array<i32>} : memref<64x32xf32, #tpu.memory_space<vmem>>, vector<8x32xf32>,
    %135 = vector.extract_strided_slice %6 {offsets = [56, 0], sizes = [8, 128], strides = [1, 1]} : vector<64x128xf32> to vector<8x128xf32>
    %cst_38 = arith.constant dense<0.000000e+00> : vector<8x128xf32>
    %136 = tpu.matmul %133, %1, %cst_38 {dimension_numbers = #tpu.dot_dimension_numbers<[1], [0], [0], [1], [0, 0, 1, 1], [], []>} : vector<8x32xf32>, vector<32x128xf32>, vector<8x128xf32> -> vector<8x128xf32>
    %137 = arith.addf %135, %136 : vector<8x128xf32>
    %138 = math.tanh %137 : vector<8x128xf32>
    %cst_39 = arith.constant 5.000000e-01 : f32
    %139 = vector.broadcast %cst_39 : f32 to vector<8x128xf32>
    %140 = arith.mulf %139, %138 : vector<8x128xf32>
    %cst_40 = arith.constant 5.000000e-01 : f32
    %141 = vector.broadcast %cst_40 : f32 to vector<8x128xf32>
    %142 = arith.addf %140, %141 : vector<8x128xf32>
    %143 = vector.extract_strided_slice %142 {offsets = [0, 0], sizes = [8, 32], strides = [1, 1]} : vector<8x128xf32> to vector<8x32xf32>
    %144 = vector.extract_strided_slice %142 {offsets = [0, 32], sizes = [8, 32], strides = [1, 1]} : vector<8x128xf32> to vector<8x32xf32>
    %145 = vector.extract_strided_slice %138 {offsets = [0, 64], sizes = [8, 32], strides = [1, 1]} : vector<8x128xf32> to vector<8x32xf32>
    %146 = vector.extract_strided_slice %142 {offsets = [0, 96], sizes = [8, 32], strides = [1, 1]} : vector<8x128xf32> to vector<8x32xf32>
    %147 = arith.mulf %144, %131 : vector<8x32xf32>
    %148 = arith.mulf %143, %145 : vector<8x32xf32>
    %149 = arith.addf %147, %148 : vector<8x32xf32>
    %150 = math.tanh %149 : vector<8x32xf32>
    %151 = arith.mulf %146, %150 : vector<8x32xf32>
    %c56 = arith.constant 56 : index
    %c0_41 = arith.constant 0 : index
    %152 = vector.load %arg11[%c56, %c0_41] : memref<64x32xf32, #tpu.memory_space<vmem>>, vector<8x32xf32>
    tpu.vector_store %arg11[%c56, %c0_41], %151 {strides = array<i32>} : memref<64x32xf32, #tpu.memory_space<vmem>>, vector<8x32xf32>,
    %c0_42 = arith.constant 0 : index
    %c0_43 = arith.constant 0 : index
    %153 = vector.load %arg4[%c0_42, %c0_43] : memref<32x128xf32, #tpu.memory_space<vmem>>, vector<32x128xf32>
    %c0_44 = arith.constant 0 : index
    %c0_45 = arith.constant 0 : index
    %154 = vector.load %arg5[%c0_44, %c0_45] : memref<32x128xf32, #tpu.memory_space<vmem>>, vector<32x128xf32>
    %c0_46 = arith.constant 0 : index
    %c0_47 = arith.constant 0 : index
    %155 = vector.load %arg6[%c0_46, %c0_47] : memref<1x128xf32, #tpu.memory_space<vmem>>, vector<1x128xf32>
    %c0_48 = arith.constant 0 : index
    %c0_49 = arith.constant 0 : index
    %156 = vector.load %arg11[%c0_48, %c0_49] : memref<64x32xf32, #tpu.memory_space<vmem>>, vector<64x32xf32>
    %cst_50 = arith.constant dense<0.000000e+00> : vector<64x128xf32>
    %157 = tpu.matmul %156, %153, %cst_50 {dimension_numbers = #tpu.dot_dimension_numbers<[1], [0], [0], [1], [0, 0, 1, 1], [], []>} : vector<64x32xf32>, vector<32x128xf32>, vector<64x128xf32> -> vector<64x128xf32>
    %158 = vector.broadcast %155 : vector<1x128xf32> to vector<64x128xf32>
    %159 = arith.addf %157, %158 : vector<64x128xf32>
    %cst_51 = arith.constant 0.000000e+00 : f32
    %160 = vector.broadcast %cst_51 : f32 to vector<8x32xf32>
    %cst_52 = arith.constant 0.000000e+00 : f32
    %161 = vector.broadcast %cst_52 : f32 to vector<8x32xf32>
    %162 = vector.extract_strided_slice %159 {offsets = [0, 0], sizes = [8, 128], strides = [1, 1]} : vector<64x128xf32> to vector<8x128xf32>
    %cst_53 = arith.constant dense<0.000000e+00> : vector<8x128xf32>
    %163 = tpu.matmul %160, %154, %cst_53 {dimension_numbers = #tpu.dot_dimension_numbers<[1], [0], [0], [1], [0, 0, 1, 1], [], []>} : vector<8x32xf32>, vector<32x128xf32>, vector<8x128xf32> -> vector<8x128xf32>
    %164 = arith.addf %162, %163 : vector<8x128xf32>
    %165 = math.tanh %164 : vector<8x128xf32>
    %cst_54 = arith.constant 5.000000e-01 : f32
    %166 = vector.broadcast %cst_54 : f32 to vector<8x128xf32>
    %167 = arith.mulf %166, %165 : vector<8x128xf32>
    %cst_55 = arith.constant 5.000000e-01 : f32
    %168 = vector.broadcast %cst_55 : f32 to vector<8x128xf32>
    %169 = arith.addf %167, %168 : vector<8x128xf32>
    %170 = vector.extract_strided_slice %169 {offsets = [0, 0], sizes = [8, 32], strides = [1, 1]} : vector<8x128xf32> to vector<8x32xf32>
    %171 = vector.extract_strided_slice %169 {offsets = [0, 32], sizes = [8, 32], strides = [1, 1]} : vector<8x128xf32> to vector<8x32xf32>
    %172 = vector.extract_strided_slice %165 {offsets = [0, 64], sizes = [8, 32], strides = [1, 1]} : vector<8x128xf32> to vector<8x32xf32>
    %173 = vector.extract_strided_slice %169 {offsets = [0, 96], sizes = [8, 32], strides = [1, 1]} : vector<8x128xf32> to vector<8x32xf32>
    %174 = arith.mulf %171, %161 : vector<8x32xf32>
    %175 = arith.mulf %170, %172 : vector<8x32xf32>
    %176 = arith.addf %174, %175 : vector<8x32xf32>
    %177 = math.tanh %176 : vector<8x32xf32>
    %178 = arith.mulf %173, %177 : vector<8x32xf32>
    %179 = vector.extract_strided_slice %159 {offsets = [8, 0], sizes = [8, 128], strides = [1, 1]} : vector<64x128xf32> to vector<8x128xf32>
    %cst_56 = arith.constant dense<0.000000e+00> : vector<8x128xf32>
    %180 = tpu.matmul %178, %154, %cst_56 {dimension_numbers = #tpu.dot_dimension_numbers<[1], [0], [0], [1], [0, 0, 1, 1], [], []>} : vector<8x32xf32>, vector<32x128xf32>, vector<8x128xf32> -> vector<8x128xf32>
    %181 = arith.addf %179, %180 : vector<8x128xf32>
    %182 = math.tanh %181 : vector<8x128xf32>
    %cst_57 = arith.constant 5.000000e-01 : f32
    %183 = vector.broadcast %cst_57 : f32 to vector<8x128xf32>
    %184 = arith.mulf %183, %182 : vector<8x128xf32>
    %cst_58 = arith.constant 5.000000e-01 : f32
    %185 = vector.broadcast %cst_58 : f32 to vector<8x128xf32>
    %186 = arith.addf %184, %185 : vector<8x128xf32>
    %187 = vector.extract_strided_slice %186 {offsets = [0, 0], sizes = [8, 32], strides = [1, 1]} : vector<8x128xf32> to vector<8x32xf32>
    %188 = vector.extract_strided_slice %186 {offsets = [0, 32], sizes = [8, 32], strides = [1, 1]} : vector<8x128xf32> to vector<8x32xf32>
    %189 = vector.extract_strided_slice %182 {offsets = [0, 64], sizes = [8, 32], strides = [1, 1]} : vector<8x128xf32> to vector<8x32xf32>
    %190 = vector.extract_strided_slice %186 {offsets = [0, 96], sizes = [8, 32], strides = [1, 1]} : vector<8x128xf32> to vector<8x32xf32>
    %191 = arith.mulf %188, %176 : vector<8x32xf32>
    %192 = arith.mulf %187, %189 : vector<8x32xf32>
    %193 = arith.addf %191, %192 : vector<8x32xf32>
    %194 = math.tanh %193 : vector<8x32xf32>
    %195 = arith.mulf %190, %194 : vector<8x32xf32>
    %196 = vector.extract_strided_slice %159 {offsets = [16, 0], sizes = [8, 128], strides = [1, 1]} : vector<64x128xf32> to vector<8x128xf32>
    %cst_59 = arith.constant dense<0.000000e+00> : vector<8x128xf32>
    %197 = tpu.matmul %195, %154, %cst_59 {dimension_numbers = #tpu.dot_dimension_numbers<[1], [0], [0], [1], [0, 0, 1, 1], [], []>} : vector<8x32xf32>, vector<32x128xf32>, vector<8x128xf32> -> vector<8x128xf32>
    %198 = arith.addf %196, %197 : vector<8x128xf32>
    %199 = math.tanh %198 : vector<8x128xf32>
    %cst_60 = arith.constant 5.000000e-01 : f32
    %200 = vector.broadcast %cst_60 : f32 to vector<8x128xf32>
    %201 = arith.mulf %200, %199 : vector<8x128xf32>
    %cst_61 = arith.constant 5.000000e-01 : f32
    %202 = vector.broadcast %cst_61 : f32 to vector<8x128xf32>
    %203 = arith.addf %201, %202 : vector<8x128xf32>
    %204 = vector.extract_strided_slice %203 {offsets = [0, 0], sizes = [8, 32], strides = [1, 1]} : vector<8x128xf32> to vector<8x32xf32>
    %205 = vector.extract_strided_slice %203 {offsets = [0, 32], sizes = [8, 32], strides = [1, 1]} : vector<8x128xf32> to vector<8x32xf32>
    %206 = vector.extract_strided_slice %199 {offsets = [0, 64], sizes = [8, 32], strides = [1, 1]} : vector<8x128xf32> to vector<8x32xf32>
    %207 = vector.extract_strided_slice %203 {offsets = [0, 96], sizes = [8, 32], strides = [1, 1]} : vector<8x128xf32> to vector<8x32xf32>
    %208 = arith.mulf %205, %193 : vector<8x32xf32>
    %209 = arith.mulf %204, %206 : vector<8x32xf32>
    %210 = arith.addf %208, %209 : vector<8x32xf32>
    %211 = math.tanh %210 : vector<8x32xf32>
    %212 = arith.mulf %207, %211 : vector<8x32xf32>
    %213 = vector.extract_strided_slice %159 {offsets = [24, 0], sizes = [8, 128], strides = [1, 1]} : vector<64x128xf32> to vector<8x128xf32>
    %cst_62 = arith.constant dense<0.000000e+00> : vector<8x128xf32>
    %214 = tpu.matmul %212, %154, %cst_62 {dimension_numbers = #tpu.dot_dimension_numbers<[1], [0], [0], [1], [0, 0, 1, 1], [], []>} : vector<8x32xf32>, vector<32x128xf32>, vector<8x128xf32> -> vector<8x128xf32>
    %215 = arith.addf %213, %214 : vector<8x128xf32>
    %216 = math.tanh %215 : vector<8x128xf32>
    %cst_63 = arith.constant 5.000000e-01 : f32
    %217 = vector.broadcast %cst_63 : f32 to vector<8x128xf32>
    %218 = arith.mulf %217, %216 : vector<8x128xf32>
    %cst_64 = arith.constant 5.000000e-01 : f32
    %219 = vector.broadcast %cst_64 : f32 to vector<8x128xf32>
    %220 = arith.addf %218, %219 : vector<8x128xf32>
    %221 = vector.extract_strided_slice %220 {offsets = [0, 0], sizes = [8, 32], strides = [1, 1]} : vector<8x128xf32> to vector<8x32xf32>
    %222 = vector.extract_strided_slice %220 {offsets = [0, 32], sizes = [8, 32], strides = [1, 1]} : vector<8x128xf32> to vector<8x32xf32>
    %223 = vector.extract_strided_slice %216 {offsets = [0, 64], sizes = [8, 32], strides = [1, 1]} : vector<8x128xf32> to vector<8x32xf32>
    %224 = vector.extract_strided_slice %220 {offsets = [0, 96], sizes = [8, 32], strides = [1, 1]} : vector<8x128xf32> to vector<8x32xf32>
    %225 = arith.mulf %222, %210 : vector<8x32xf32>
    %226 = arith.mulf %221, %223 : vector<8x32xf32>
    %227 = arith.addf %225, %226 : vector<8x32xf32>
    %228 = math.tanh %227 : vector<8x32xf32>
    %229 = arith.mulf %224, %228 : vector<8x32xf32>
    %230 = vector.extract_strided_slice %159 {offsets = [32, 0], sizes = [8, 128], strides = [1, 1]} : vector<64x128xf32> to vector<8x128xf32>
    %cst_65 = arith.constant dense<0.000000e+00> : vector<8x128xf32>
    %231 = tpu.matmul %229, %154, %cst_65 {dimension_numbers = #tpu.dot_dimension_numbers<[1], [0], [0], [1], [0, 0, 1, 1], [], []>} : vector<8x32xf32>, vector<32x128xf32>, vector<8x128xf32> -> vector<8x128xf32>
    %232 = arith.addf %230, %231 : vector<8x128xf32>
    %233 = math.tanh %232 : vector<8x128xf32>
    %cst_66 = arith.constant 5.000000e-01 : f32
    %234 = vector.broadcast %cst_66 : f32 to vector<8x128xf32>
    %235 = arith.mulf %234, %233 : vector<8x128xf32>
    %cst_67 = arith.constant 5.000000e-01 : f32
    %236 = vector.broadcast %cst_67 : f32 to vector<8x128xf32>
    %237 = arith.addf %235, %236 : vector<8x128xf32>
    %238 = vector.extract_strided_slice %237 {offsets = [0, 0], sizes = [8, 32], strides = [1, 1]} : vector<8x128xf32> to vector<8x32xf32>
    %239 = vector.extract_strided_slice %237 {offsets = [0, 32], sizes = [8, 32], strides = [1, 1]} : vector<8x128xf32> to vector<8x32xf32>
    %240 = vector.extract_strided_slice %233 {offsets = [0, 64], sizes = [8, 32], strides = [1, 1]} : vector<8x128xf32> to vector<8x32xf32>
    %241 = vector.extract_strided_slice %237 {offsets = [0, 96], sizes = [8, 32], strides = [1, 1]} : vector<8x128xf32> to vector<8x32xf32>
    %242 = arith.mulf %239, %227 : vector<8x32xf32>
    %243 = arith.mulf %238, %240 : vector<8x32xf32>
    %244 = arith.addf %242, %243 : vector<8x32xf32>
    %245 = math.tanh %244 : vector<8x32xf32>
    %246 = arith.mulf %241, %245 : vector<8x32xf32>
    %247 = vector.extract_strided_slice %159 {offsets = [40, 0], sizes = [8, 128], strides = [1, 1]} : vector<64x128xf32> to vector<8x128xf32>
    %cst_68 = arith.constant dense<0.000000e+00> : vector<8x128xf32>
    %248 = tpu.matmul %246, %154, %cst_68 {dimension_numbers = #tpu.dot_dimension_numbers<[1], [0], [0], [1], [0, 0, 1, 1], [], []>} : vector<8x32xf32>, vector<32x128xf32>, vector<8x128xf32> -> vector<8x128xf32>
    %249 = arith.addf %247, %248 : vector<8x128xf32>
    %250 = math.tanh %249 : vector<8x128xf32>
    %cst_69 = arith.constant 5.000000e-01 : f32
    %251 = vector.broadcast %cst_69 : f32 to vector<8x128xf32>
    %252 = arith.mulf %251, %250 : vector<8x128xf32>
    %cst_70 = arith.constant 5.000000e-01 : f32
    %253 = vector.broadcast %cst_70 : f32 to vector<8x128xf32>
    %254 = arith.addf %252, %253 : vector<8x128xf32>
    %255 = vector.extract_strided_slice %254 {offsets = [0, 0], sizes = [8, 32], strides = [1, 1]} : vector<8x128xf32> to vector<8x32xf32>
    %256 = vector.extract_strided_slice %254 {offsets = [0, 32], sizes = [8, 32], strides = [1, 1]} : vector<8x128xf32> to vector<8x32xf32>
    %257 = vector.extract_strided_slice %250 {offsets = [0, 64], sizes = [8, 32], strides = [1, 1]} : vector<8x128xf32> to vector<8x32xf32>
    %258 = vector.extract_strided_slice %254 {offsets = [0, 96], sizes = [8, 32], strides = [1, 1]} : vector<8x128xf32> to vector<8x32xf32>
    %259 = arith.mulf %256, %244 : vector<8x32xf32>
    %260 = arith.mulf %255, %257 : vector<8x32xf32>
    %261 = arith.addf %259, %260 : vector<8x32xf32>
    %262 = math.tanh %261 : vector<8x32xf32>
    %263 = arith.mulf %258, %262 : vector<8x32xf32>
    %264 = vector.extract_strided_slice %159 {offsets = [48, 0], sizes = [8, 128], strides = [1, 1]} : vector<64x128xf32> to vector<8x128xf32>
    %cst_71 = arith.constant dense<0.000000e+00> : vector<8x128xf32>
    %265 = tpu.matmul %263, %154, %cst_71 {dimension_numbers = #tpu.dot_dimension_numbers<[1], [0], [0], [1], [0, 0, 1, 1], [], []>} : vector<8x32xf32>, vector<32x128xf32>, vector<8x128xf32> -> vector<8x128xf32>
    %266 = arith.addf %264, %265 : vector<8x128xf32>
    %267 = math.tanh %266 : vector<8x128xf32>
    %cst_72 = arith.constant 5.000000e-01 : f32
    %268 = vector.broadcast %cst_72 : f32 to vector<8x128xf32>
    %269 = arith.mulf %268, %267 : vector<8x128xf32>
    %cst_73 = arith.constant 5.000000e-01 : f32
    %270 = vector.broadcast %cst_73 : f32 to vector<8x128xf32>
    %271 = arith.addf %269, %270 : vector<8x128xf32>
    %272 = vector.extract_strided_slice %271 {offsets = [0, 0], sizes = [8, 32], strides = [1, 1]} : vector<8x128xf32> to vector<8x32xf32>
    %273 = vector.extract_strided_slice %271 {offsets = [0, 32], sizes = [8, 32], strides = [1, 1]} : vector<8x128xf32> to vector<8x32xf32>
    %274 = vector.extract_strided_slice %267 {offsets = [0, 64], sizes = [8, 32], strides = [1, 1]} : vector<8x128xf32> to vector<8x32xf32>
    %275 = vector.extract_strided_slice %271 {offsets = [0, 96], sizes = [8, 32], strides = [1, 1]} : vector<8x128xf32> to vector<8x32xf32>
    %276 = arith.mulf %273, %261 : vector<8x32xf32>
    %277 = arith.mulf %272, %274 : vector<8x32xf32>
    %278 = arith.addf %276, %277 : vector<8x32xf32>
    %279 = math.tanh %278 : vector<8x32xf32>
    %280 = arith.mulf %275, %279 : vector<8x32xf32>
    %281 = vector.extract_strided_slice %159 {offsets = [56, 0], sizes = [8, 128], strides = [1, 1]} : vector<64x128xf32> to vector<8x128xf32>
    %cst_74 = arith.constant dense<0.000000e+00> : vector<8x128xf32>
    %282 = tpu.matmul %280, %154, %cst_74 {dimension_numbers = #tpu.dot_dimension_numbers<[1], [0], [0], [1], [0, 0, 1, 1], [], []>} : vector<8x32xf32>, vector<32x128xf32>, vector<8x128xf32> -> vector<8x128xf32>
    %283 = arith.addf %281, %282 : vector<8x128xf32>
    %284 = math.tanh %283 : vector<8x128xf32>
    %cst_75 = arith.constant 5.000000e-01 : f32
    %285 = vector.broadcast %cst_75 : f32 to vector<8x128xf32>
    %286 = arith.mulf %285, %284 : vector<8x128xf32>
    %cst_76 = arith.constant 5.000000e-01 : f32
    %287 = vector.broadcast %cst_76 : f32 to vector<8x128xf32>
    %288 = arith.addf %286, %287 : vector<8x128xf32>
    %289 = vector.extract_strided_slice %288 {offsets = [0, 0], sizes = [8, 32], strides = [1, 1]} : vector<8x128xf32> to vector<8x32xf32>
    %290 = vector.extract_strided_slice %288 {offsets = [0, 32], sizes = [8, 32], strides = [1, 1]} : vector<8x128xf32> to vector<8x32xf32>
    %291 = vector.extract_strided_slice %284 {offsets = [0, 64], sizes = [8, 32], strides = [1, 1]} : vector<8x128xf32> to vector<8x32xf32>
    %292 = vector.extract_strided_slice %288 {offsets = [0, 96], sizes = [8, 32], strides = [1, 1]} : vector<8x128xf32> to vector<8x32xf32>
    %293 = arith.mulf %290, %278 : vector<8x32xf32>
    %294 = arith.mulf %289, %291 : vector<8x32xf32>
    %295 = arith.addf %293, %294 : vector<8x32xf32>
    %296 = math.tanh %295 : vector<8x32xf32>
    %297 = arith.mulf %292, %296 : vector<8x32xf32>
    %c0_77 = arith.constant 0 : index
    %c0_78 = arith.constant 0 : index
    %298 = vector.load %arg7[%c0_77, %c0_78] : memref<32x128xf32, #tpu.memory_space<vmem>>, vector<32x128xf32>
    %cst_79 = arith.constant dense<0.000000e+00> : vector<8x128xf32>
    %299 = tpu.matmul %297, %298, %cst_79 {dimension_numbers = #tpu.dot_dimension_numbers<[1], [0], [0], [1], [0, 0, 1, 1], [], []>} : vector<8x32xf32>, vector<32x128xf32>, vector<8x128xf32> -> vector<8x128xf32>
    %c0_80 = arith.constant 0 : index
    %c0_81 = arith.constant 0 : index
    %300 = vector.load %arg8[%c0_80, %c0_81] : memref<1x128xf32, #tpu.memory_space<vmem>>, vector<1x128xf32>
    %301 = vector.broadcast %300 : vector<1x128xf32> to vector<8x128xf32>
    %302 = arith.addf %299, %301 : vector<8x128xf32>
    %c0_82 = arith.constant 0 : index
    %c0_83 = arith.constant 0 : index
    %303 = vector.load %arg9[%c0_82, %c0_83] : memref<8x128xf32, #tpu.memory_space<vmem>>, vector<8x128xf32>
    tpu.vector_store %arg9[%c0_82, %c0_83], %302 {strides = array<i32>} : memref<8x128xf32, #tpu.memory_space<vmem>>, vector<8x128xf32>,
    return
  }
}

</mosaic_0001>

<bundles_post_ra>
// kernel: lstm_forward.1
= control target key start
LH: loop header
LB: loop body
LE: loop exit
PB: predicated region body
PF: predicated region fallthrough
CT: control target
= control target key end

     0   :  { %vm49_vm0 = vcmask 64512   ;;  %v1088_v6 = vmov 0.0   ;;  %s1089_s21 = smov 64   ;;  %s1090_s22 = smov 32   ;;  %vm115_vm1 = vcmask 261120   ;;  %s1443_s2 = inlined_call_operand.vmem [shape: f32[32,128], index: 2, kind: input, shape index: {}]   ;;  %s1444_s1 = inlined_call_operand.vmem [shape: f32[8,128], index: 1, kind: input, shape index: {}]   ;;  %s1445_s0 = inlined_call_operand.vmem [shape: f32[64,8], index: 0, kind: input, shape index: {}]   ;;  %s1446_s3 = inlined_call_operand.vmem [shape: f32[1,128], index: 3, kind: input, shape index: {}]   ;;  %s1447_s4 = inlined_call_operand.vmem [shape: f32[32,128], index: 4, kind: input, shape index: {}]   ;;  %s1448_s6 = inlined_call_operand.vmem [shape: f32[1,128], index: 6, kind: input, shape index: {}]   ;;  %s1449_s5 = inlined_call_operand.vmem [shape: f32[32,128], index: 5, kind: input, shape index: {}]   ;;  %s1450_s7 = inlined_call_operand.vmem [shape: f32[32,128], index: 7, kind: input, shape index: {}]   ;;  %s1451_s8 = inlined_call_operand.vmem [shape: f32[1,128], index: 8, kind: input, shape index: {}]   ;;  %s1452_s9 = inlined_call_operand.vmem [shape: f32[8,128], index: 9, kind: output, shape index: {}]  }
   0x1   :  { %v1144_v0 = vld [vmem:[%s1443_s2 + $0x18] sm:$0xff]  ;;  %v1149_v1 = vld [vmem:[%s1443_s2 + $0x10] sm:$0xff]  ;;  %v32_v2 = vld [vmem:[%s1444_s1] sm:$0xff] }
   0x2   :  { %131 = vmatpush.msra.mxu1 %v1144_v0  ;;  %89 = vmatpush.msra.mxu0 %v32_v2  ;;  %v38_v3 = vld [vmem:[%s1445_s0] sm:$0xff]  ;;  %v1161_v4 = vld [vmem:[%s1443_s2 + $0x8] sm:$0xff]  ;;  %v504_v23 = vld [vmem:[%s1447_s4 + $0x18] sm:$0xff] }
   0x3   :  { %987 = vmatmul.msk.f32.vlgmr.msra.gmra.mxu0 %vm49_vm0, %v38_v3  ;;  %179 = vmatpush.msra.mxu2 %v1144_v0  ;;  %v1170_v5 = vld [vmem:[%s1443_s2] sm:$0xff]  ;;  %v503_v24 = vld [vmem:[%s1447_s4 + $0x10] sm:$0xff]  ;;  %v39_v25 = vld [vmem:[%s1445_s0 + $0x8] sm:$0xff] }
   0x4   :  { %132 = vmatpush.msra.mxu1 %v1149_v1  ;;  %371 = vmatpush.msrb.mxu0 %v1144_v0  ;;  %v1196_v7 = vld [vmem:[%s1446_s3] ss:$0 sm:$0xff]  ;;  %v502_v26 = vld [vmem:[%s1447_s4 + $0x8] sm:$0xff]  ;;  %v40_v45 = vld [vmem:[%s1445_s0 + $0x10] sm:$0xff] }
   0x5   :  { %180 = vmatpush.msra.mxu2 %v1149_v1  ;;  %557 = vmatpush.msra.mxu3 %v504_v23  ;;  %v501_v27 = vld [vmem:[%s1447_s4] sm:$0xff]  ;;  %v41_v61 = vld [vmem:[%s1445_s0 + $0x18] sm:$0xff] }
   0x6   :  { %133 = vmatpush.msra.mxu1 %v1161_v4  ;;  %372 = vmatpush.msrb.mxu0 %v1149_v1 }
   0x7   :  { %181 = vmatpush.msra.mxu2 %v1161_v4  ;;  %558 = vmatpush.msra.mxu3 %v503_v24 }
   0x8   :  { %134 = vmatpush.msra.mxu1 %v1170_v5  ;;  %373 = vmatpush.msrb.mxu0 %v1161_v4 }
   0x9   :  { %135 = vmatmul.f32.vlgmr.msra.gmra.mxu1 %v1088_v6  ;;  %182 = vmatpush.msra.mxu2 %v1170_v5 }
   0xa   :  { %275 = vmatpush.msrb.mxu1 %v1144_v0  ;;  %374 = vmatpush.msrb.mxu0 %v1170_v5 }
   0xb   :  { %227 = vmatpush.msrb.mxu2 %v1144_v0  ;;  %988 = vmatmul.msk.f32.gmra.mxu0 %vm49_vm0, %v39_v25 }
   0xc   :  { %276 = vmatpush.msrb.mxu1 %v1149_v1  ;;  %559 = vmatpush.msra.mxu3 %v502_v26 }
   0xd   :  { %228 = vmatpush.msrb.mxu2 %v1149_v1 }
   0xe   :  { %277 = vmatpush.msrb.mxu1 %v1161_v4  ;;  %560 = vmatpush.msra.mxu3 %v501_v27 }
   0xf   :  { %229 = vmatpush.msrb.mxu2 %v1161_v4 }
  0x10   :  { %278 = vmatpush.msrb.mxu1 %v1170_v5 }
  0x11   :  { %230 = vmatpush.msrb.mxu2 %v1170_v5 }
  0x12   :  { %419 = vmatpush.msra.mxu1 %v1144_v0 }
  0x13   :  { %989 = vmatmul.msk.f32.gmra.mxu0 %vm49_vm0, %v40_v45 }
  0x14   :  { %420 = vmatpush.msra.mxu1 %v1149_v1 }
  0x16   :  { %421 = vmatpush.msra.mxu1 %v1161_v4 }
  0x18   :  { %422 = vmatpush.msra.mxu1 %v1170_v5 }
  0x1b   :  { %990 = vmatmul.msk.f32.gmra.mxu0 %vm49_vm0, %v41_v61  ;;  %v1308_v61 = vld [vmem:[%s1449_s5 + $0x8] sm:$0xff] }
  0x80   :  { %v91_v8 = vpop.f32.mrf.mxu0 }
  0x81   :  { %v92_v9 = vadd.f32 %v1196_v7, %v91_v8 }
  0x86   :  { %v136_v10 = vpop.f32.mrf.mxu1 }
  0x87   :  { %v139_v11 = vadd.f32 %v136_v10, %v92_v9 }
  0x88   :  { %v94_v30 = vpop.f32.mrf.mxu0 }
  0x89   :  { %1024 = vtanh.f32 %v139_v11  ;;  %v95_v31 = vadd.f32 %v1196_v7, %v94_v30 }
  0x8f   :  { %v1025_v12 = vpop.eup %1024 }
  0x90   :  { %145 = vrot.lane.b32.xlu0 %v1025_v12, %s1089_s21  ;;  %v141_v13 = vmul.f32 0.5, %v1025_v12  ;;  %v97_v48 = vpop.f32.mrf.mxu0 }
  0x91   :  { %v98_v49 = vadd.f32 %v1196_v7, %v97_v48 }
  0x92   :  { %v142_v14 = vadd.f32 0.5, %v141_v13 }
  0x94   :  { %v143_v17 = vmul.f32 0.0, %v142_v14 }
  0x98   :  { %v100_v2 = vpop.f32.mrf.mxu0 }
  0x99   :  { %v101_v3 = vadd.f32 %v1196_v7, %v100_v2 }
 0x102   :  { %v146_v15 = vpop.permute.xlu0 %145 }
 0x103   :  { %v148_v16 = vmul.f32 %v146_v15, %v142_v14 }
 0x105   :  { %150 = vrot.lane.b32.xlu0 %v148_v16, %s1090_s22 }
 0x177   :  { %v151_v18 = vpop.permute.xlu0 %150 }
 0x178   :  { %v153_v19 = vadd.f32 %v151_v18, %v143_v17 }
 0x17a   :  { %1026 = vtanh.f32 %v153_v19 }
 0x180   :  { %v1027_v20 = vpop.eup %1026 }
 0x181   :  { %156 = vrot.lane.b32.xlu1 %v1027_v20, %s1089_s21 }
 0x1f3   :  { %v157_v21 = vpop.permute.xlu1 %156 }
 0x1f4   :  { %v159_v22 = vmul.f32 %v157_v21, %v142_v14 }
 0x1f6   :  { %161 = vrot.lane.b32.xlu1 %v159_v22, %s1090_s22 }
 0x268   :  { %v162_v28 = vpop.permute.xlu1 %161 }
 0x269   :  { %164 = vst.msk [vmem:[#allocation3] sm:$0xff] %vm115_vm1, %v162_v28  ;;  %995 = vmatmul.msk.f32.vlgmr.msra.gmra.mxu2 %vm115_vm1, %v162_v28 }
 0x26a   :  { %323 = vmatpush.msra.mxu2 %v1144_v0 }
 0x26c   :  { %324 = vmatpush.msra.mxu2 %v1149_v1 }
 0x26e   :  { %325 = vmatpush.msra.mxu2 %v1161_v4 }
 0x270   :  { %v510_v29 = vld [vmem:[#allocation3] sm:$0xff]  ;;  %326 = vmatpush.msra.mxu2 %v1170_v5 }
 0x271   :  { %1002 = vmatmul.msk.f32.vlgmr.msra.gmra.mxu3 %vm115_vm1, %v510_v29 }
 0x2ec   :  { %v184_v32 = vpop.f32.mrf.mxu2 }
 0x2ed   :  { %v187_v33 = vadd.f32 %v184_v32, %v95_v31 }
 0x2ef   :  { %1028 = vtanh.f32 %v187_v33 }
 0x2f5   :  { %v1029_v34 = vpop.eup %1028 }
 0x2f6   :  { %193 = vrot.lane.b32.xlu2 %v1029_v34, %s1089_s21  ;;  %v189_v35 = vmul.f32 0.5, %v1029_v34 }
 0x2f8   :  { %v190_v36 = vadd.f32 0.5, %v189_v35  ;;  %v43_v35 = vld [vmem:[%s1445_s0 + $0x28] sm:$0xff] }
 0x2fa   :  { %v191_v39 = vmul.f32 %v190_v36, %v153_v19  ;;  %v42_v19 = vld [vmem:[%s1445_s0 + $0x20] sm:$0xff] }
 0x2fb   :  { %991 = vmatmul.msk.f32.gmra.mxu0 %vm49_vm0, %v42_v19 }
 0x303   :  { %992 = vmatmul.msk.f32.gmra.mxu0 %vm49_vm0, %v43_v35 }
 0x350   :  { %v194_v37 = vpop.permute.xlu2 %193 }
 0x351   :  { %v196_v38 = vmul.f32 %v194_v37, %v190_v36  ;;  %v45_v37 = vld [vmem:[%s1445_s0 + $0x38] sm:$0xff] }
 0x353   :  { %198 = vrot.lane.b32.xlu2 %v196_v38, %s1090_s22 }
 0x378   :  { %v103_v22 = vpop.f32.mrf.mxu0 }
 0x379   :  { %v104_v23 = vadd.f32 %v1196_v7, %v103_v22 }
 0x3ad   :  { %v199_v40 = vpop.permute.xlu2 %198 }
 0x3ae   :  { %v201_v41 = vadd.f32 %v199_v40, %v191_v39 }
 0x3b0   :  { %1030 = vtanh.f32 %v201_v41 }
 0x3b6   :  { %v1031_v42 = vpop.eup %1030 }
 0x3b7   :  { %204 = vrot.lane.b32.xlu0 %v1031_v42, %s1089_s21  ;;  %v106_v42 = vpop.f32.mrf.mxu0 }
 0x3b8   :  { %v107_v45 = vadd.f32 %v1196_v7, %v106_v42 }
 0x429   :  { %v205_v43 = vpop.permute.xlu0 %204 }
 0x42a   :  { %v207_v44 = vmul.f32 %v205_v43, %v190_v36  ;;  %v44_v36 = vld [vmem:[%s1445_s0 + $0x30] sm:$0xff] }
 0x42b   :  { %993 = vmatmul.msk.f32.gmra.mxu0 %vm49_vm0, %v44_v36 }
 0x42c   :  { %209 = vrot.lane.b32.xlu1 %v207_v44, %s1090_s22 }
 0x433   :  { %994 = vmatmul.msk.f32.gmra.mxu0 %vm49_vm0, %v45_v37 }
 0x49e   :  { %v210_v46 = vpop.permute.xlu1 %209 }
 0x49f   :  { %212 = vst.msk [vmem:[#allocation3 + $0x8] sm:$0xff] %vm115_vm1, %v210_v46  ;;  %996 = vmatmul.msk.f32.vlgmr.msrb.gmra.mxu2 %vm115_vm1, %v210_v46 }
 0x4a0   :  { %467 = vmatpush.msrb.mxu2 %v1144_v0 }
 0x4a2   :  { %468 = vmatpush.msrb.mxu2 %v1149_v1 }
 0x4a4   :  { %469 = vmatpush.msrb.mxu2 %v1161_v4 }
 0x4a6   :  { %v511_v47 = vld [vmem:[#allocation3 + $0x8] sm:$0xff]  ;;  %470 = vmatpush.msrb.mxu2 %v1170_v5 }
 0x4a7   :  { %1003 = vmatmul.msk.f32.gmra.mxu3 %vm115_vm1, %v511_v47 }
 0x4a8   :  { %v109_v43 = vpop.f32.mrf.mxu0 }
 0x4b0   :  { %v1286_v44 = vpop.f32.mrf.mxu0 }
 0x522   :  { %v232_v50 = vpop.f32.mrf.mxu2 }
 0x523   :  { %v235_v51 = vadd.f32 %v232_v50, %v98_v49 }
 0x525   :  { %1032 = vtanh.f32 %v235_v51 }
 0x52b   :  { %v1033_v52 = vpop.eup %1032 }
 0x52c   :  { %241 = vrot.lane.b32.xlu2 %v1033_v52, %s1089_s21  ;;  %v237_v53 = vmul.f32 0.5, %v1033_v52 }
 0x52e   :  { %v238_v54 = vadd.f32 0.5, %v237_v53 }
 0x530   :  { %v239_v57 = vmul.f32 %v238_v54, %v201_v41 }
 0x586   :  { %v242_v55 = vpop.permute.xlu2 %241 }
 0x587   :  { %v244_v56 = vmul.f32 %v242_v55, %v238_v54 }
 0x589   :  { %246 = vrot.lane.b32.xlu0 %v244_v56, %s1090_s22 }
 0x5fb   :  { %v247_v58 = vpop.permute.xlu0 %246 }
 0x5fc   :  { %v249_v59 = vadd.f32 %v247_v58, %v239_v57 }
 0x5fe   :  { %1034 = vtanh.f32 %v249_v59 }
 0x604   :  { %v1035_v60 = vpop.eup %1034 }
 0x605   :  { %252 = vrot.lane.b32.xlu1 %v1035_v60, %s1089_s21  ;;  %v1301_v60 = vld [vmem:[%s1449_s5 + $0x10] sm:$0xff] }
 0x677   :  { %v253_v62 = vpop.permute.xlu1 %252 }
 0x678   :  { %v255_v63 = vmul.f32 %v253_v62, %v238_v54  ;;  %v1315_v62 = vld [vmem:[%s1449_s5] sm:$0xff] }
 0x67a   :  { %257 = vrot.lane.b32.xlu2 %v255_v63, %s1090_s22 }
 0x6d4   :  { %v258_v0 = vpop.permute.xlu2 %257 }
 0x6d5   :  { %260 = vst.msk [vmem:[#allocation3 + $0x10] sm:$0xff] %vm115_vm1, %v258_v0  ;;  %997 = vmatmul.msk.f32.vlgmr.msrb.gmra.mxu1 %vm115_vm1, %v258_v0 }
 0x6dc   :  { %v512_v1 = vld [vmem:[#allocation3 + $0x10] sm:$0xff] }
 0x6dd   :  { %1004 = vmatmul.msk.f32.gmra.mxu3 %vm115_vm1, %v512_v1  ;;  %v110_v1 = vadd.f32 %v1196_v7, %v109_v43 }
 0x752   :  { %v280_v4 = vpop.f32.mrf.mxu1 }
 0x753   :  { %v283_v5 = vadd.f32 %v280_v4, %v101_v3  ;;  %v1337_v4 = vld [vmem:[%s1448_s6] ss:$0 sm:$0xff] }
 0x755   :  { %1036 = vtanh.f32 %v283_v5  ;;  %v562_v5 = vpop.f32.mrf.mxu3 }
 0x75b   :  { %v1037_v8 = vpop.eup %1036 }
 0x75c   :  { %289 = vrot.lane.b32.xlu0 %v1037_v8, %s1089_s21  ;;  %v285_v9 = vmul.f32 0.5, %v1037_v8 }
 0x75d   :  { %v565_v36 = vpop.f32.mrf.mxu3 }
 0x75e   :  { %v286_v10 = vadd.f32 0.5, %v285_v9  ;;  %v566_v37 = vadd.f32 %v1337_v4, %v565_v36 }
 0x760   :  { %v287_v13 = vmul.f32 %v286_v10, %v249_v59  ;;  %v1296_v59 = vld [vmem:[%s1449_s5 + $0x18] sm:$0xff] }
 0x761   :  { %598 = vmatpush.msrb.mxu1 %v1296_v59 }
 0x763   :  { %599 = vmatpush.msrb.mxu1 %v1301_v60 }
 0x765   :  { %600 = vmatpush.msrb.mxu1 %v1308_v61 }
 0x767   :  { %601 = vmatpush.msrb.mxu1 %v1315_v62 }
 0x7ce   :  { %v290_v11 = vpop.permute.xlu0 %289 }
 0x7cf   :  { %v292_v12 = vmul.f32 %v290_v11, %v286_v10 }
 0x7d1   :  { %294 = vrot.lane.b32.xlu1 %v292_v12, %s1090_s22 }
 0x843   :  { %v295_v14 = vpop.permute.xlu1 %294 }
 0x844   :  { %v297_v15 = vadd.f32 %v295_v14, %v287_v13 }
 0x846   :  { %1038 = vtanh.f32 %v297_v15 }
 0x84c   :  { %v1039_v16 = vpop.eup %1038 }
 0x84d   :  { %300 = vrot.lane.b32.xlu2 %v1039_v16, %s1089_s21 }
 0x8a7   :  { %v301_v17 = vpop.permute.xlu2 %300 }
 0x8a8   :  { %v303_v18 = vmul.f32 %v301_v17, %v286_v10 }
 0x8aa   :  { %305 = vrot.lane.b32.xlu0 %v303_v18, %s1090_s22 }
 0x91c   :  { %v306_v20 = vpop.permute.xlu0 %305 }
 0x91d   :  { %308 = vst.msk [vmem:[#allocation3 + $0x18] sm:$0xff] %vm115_vm1, %v306_v20  ;;  %998 = vmatmul.msk.f32.vlgmr.msra.gmra.mxu2 %vm115_vm1, %v306_v20 }
 0x91e   :  { %644 = vmatpush.msra.mxu2 %v1296_v59 }
 0x920   :  { %645 = vmatpush.msra.mxu2 %v1301_v60 }
 0x922   :  { %646 = vmatpush.msra.mxu2 %v1308_v61 }
 0x924   :  { %v513_v21 = vld [vmem:[#allocation3 + $0x18] sm:$0xff]  ;;  %647 = vmatpush.msra.mxu2 %v1315_v62 }
 0x925   :  { %1005 = vmatmul.msk.f32.gmra.mxu3 %vm115_vm1, %v513_v21 }
 0x9a0   :  { %v328_v24 = vpop.f32.mrf.mxu2 }
 0x9a1   :  { %v331_v25 = vadd.f32 %v328_v24, %v104_v23 }
 0x9a3   :  { %1040 = vtanh.f32 %v331_v25 }
 0x9a9   :  { %v1041_v26 = vpop.eup %1040 }
 0x9aa   :  { %337 = vrot.lane.b32.xlu1 %v1041_v26, %s1089_s21  ;;  %v333_v27 = vmul.f32 0.5, %v1041_v26 }
 0x9ac   :  { %v334_v28 = vadd.f32 0.5, %v333_v27 }
 0x9ae   :  { %v335_v31 = vmul.f32 %v334_v28, %v297_v15 }
 0xa1c   :  { %v338_v29 = vpop.permute.xlu1 %337 }
 0xa1d   :  { %v340_v30 = vmul.f32 %v338_v29, %v334_v28 }
 0xa1f   :  { %342 = vrot.lane.b32.xlu2 %v340_v30, %s1090_s22 }
 0xa79   :  { %v343_v32 = vpop.permute.xlu2 %342 }
 0xa7a   :  { %v345_v33 = vadd.f32 %v343_v32, %v335_v31 }
 0xa7c   :  { %1042 = vtanh.f32 %v345_v33 }
 0xa82   :  { %v1043_v34 = vpop.eup %1042 }
 0xa83   :  { %348 = vrot.lane.b32.xlu0 %v1043_v34, %s1089_s21 }
 0xaf5   :  { %v349_v38 = vpop.permute.xlu0 %348 }
 0xaf6   :  { %v351_v39 = vmul.f32 %v349_v38, %v334_v28 }
 0xaf8   :  { %353 = vrot.lane.b32.xlu1 %v351_v39, %s1090_s22 }
 0xb6a   :  { %v354_v40 = vpop.permute.xlu1 %353 }
 0xb6b   :  { %356 = vst.msk [vmem:[#allocation3 + $0x20] sm:$0xff] %vm115_vm1, %v354_v40  ;;  %999 = vmatmul.msk.f32.vlgmr.msrb.gmra.mxu0 %vm115_vm1, %v354_v40 }
 0xb72   :  { %v514_v41 = vld [vmem:[#allocation3 + $0x20] sm:$0xff] }
 0xb73   :  { %1006 = vmatmul.msk.f32.gmra.mxu3 %vm115_vm1, %v514_v41 }
 0xbe8   :  { %v376_v46 = vpop.f32.mrf.mxu0 }
 0xbe9   :  { %v379_v47 = vadd.f32 %v376_v46, %v107_v45 }
 0xbeb   :  { %1044 = vtanh.f32 %v379_v47 }
 0xbf1   :  { %v1045_v48 = vpop.eup %1044 }
 0xbf2   :  { %385 = vrot.lane.b32.xlu2 %v1045_v48, %s1089_s21  ;;  %v381_v49 = vmul.f32 0.5, %v1045_v48 }
 0xbf4   :  { %v382_v50 = vadd.f32 0.5, %v381_v49 }
 0xbf6   :  { %v383_v53 = vmul.f32 %v382_v50, %v345_v33 }
 0xc4c   :  { %v386_v51 = vpop.permute.xlu2 %385 }
 0xc4d   :  { %v388_v52 = vmul.f32 %v386_v51, %v382_v50 }
 0xc4f   :  { %390 = vrot.lane.b32.xlu0 %v388_v52, %s1090_s22 }
 0xcc1   :  { %v391_v54 = vpop.permute.xlu0 %390 }
 0xcc2   :  { %v393_v55 = vadd.f32 %v391_v54, %v383_v53  ;;  %v568_v53 = vpop.f32.mrf.mxu3 }
 0xcc3   :  { %v569_v54 = vadd.f32 %v1337_v4, %v568_v53 }
 0xcc4   :  { %1046 = vtanh.f32 %v393_v55 }
 0xcca   :  { %v1047_v56 = vpop.eup %1046 }
 0xccb   :  { %396 = vrot.lane.b32.xlu1 %v1047_v56, %s1089_s21 }
 0xd3d   :  { %v397_v57 = vpop.permute.xlu1 %396 }
 0xd3e   :  { %v399_v58 = vmul.f32 %v397_v57, %v382_v50 }
 0xd40   :  { %401 = vrot.lane.b32.xlu2 %v399_v58, %s1090_s22 }
 0xd9a   :  { %v402_v63 = vpop.permute.xlu2 %401 }
 0xd9b   :  { %404 = vst.msk [vmem:[#allocation3 + $0x28] sm:$0xff] %vm115_vm1, %v402_v63  ;;  %1000 = vmatmul.msk.f32.vlgmr.msra.gmra.mxu1 %vm115_vm1, %v402_v63 }
 0xd9c   :  { %690 = vmatpush.msra.mxu1 %v1296_v59 }
 0xd9e   :  { %691 = vmatpush.msra.mxu1 %v1301_v60 }
 0xda0   :  { %692 = vmatpush.msra.mxu1 %v1308_v61 }
 0xda2   :  { %v515_v0 = vld [vmem:[#allocation3 + $0x28] sm:$0xff]  ;;  %693 = vmatpush.msra.mxu1 %v1315_v62 }
 0xda3   :  { %1007 = vmatmul.msk.f32.gmra.mxu3 %vm115_vm1, %v515_v0  ;;  %602 = vmatmul.f32.vlgmr.msrb.gmra.mxu1 %v1088_v6  ;;  %v563_v6 = vadd.f32 %v1337_v4, %v562_v5 }
 0xda4   :  { %782 = vmatpush.msrb.mxu1 %v1296_v59 }
 0xda6   :  { %783 = vmatpush.msrb.mxu1 %v1301_v60 }
 0xda8   :  { %784 = vmatpush.msrb.mxu1 %v1308_v61 }
 0xdaa   :  { %785 = vmatpush.msrb.mxu1 %v1315_v62 }
 0xe18   :  { %v424_v2 = vpop.f32.mrf.mxu1 }
 0xe19   :  { %v427_v3 = vadd.f32 %v424_v2, %v110_v1 }
 0xe1b   :  { %1048 = vtanh.f32 %v427_v3 }
 0xe20   :  { %v603_v8 = vpop.f32.mrf.mxu1 }
 0xe21   :  { %v1049_v9 = vpop.eup %1048  ;;  %v606_v10 = vadd.f32 %v603_v8, %v563_v6 }
 0xe22   :  { %433 = vrot.lane.b32.xlu0 %v1049_v9, %s1089_s21  ;;  %v429_v12 = vmul.f32 0.5, %v1049_v9 }
 0xe23   :  { %1050 = vtanh.f32 %v606_v10 }
 0xe24   :  { %v430_v13 = vadd.f32 0.5, %v429_v12 }
 0xe26   :  { %v431_v20 = vmul.f32 %v430_v13, %v393_v55 }
 0xe29   :  { %v1051_v11 = vpop.eup %1050 }
 0xe2a   :  { %612 = vrot.lane.b32.xlu1 %v1051_v11, %s1089_s21  ;;  %v608_v16 = vmul.f32 0.5, %v1051_v11  ;;  %v571_v11 = vpop.f32.mrf.mxu3 }
 0xe2b   :  { %v572_v12 = vadd.f32 %v1337_v4, %v571_v11 }
 0xe2c   :  { %v609_v17 = vadd.f32 0.5, %v608_v16 }
 0xe2e   :  { %v610_v24 = vmul.f32 0.0, %v609_v17 }
 0xe94   :  { %v434_v14 = vpop.permute.xlu0 %433 }
 0xe95   :  { %v436_v15 = vmul.f32 %v434_v14, %v430_v13 }
 0xe97   :  { %438 = vrot.lane.b32.xlu2 %v436_v15, %s1090_s22 }
 0xe9c   :  { %v613_v18 = vpop.permute.xlu1 %612 }
 0xe9d   :  { %v615_v19 = vmul.f32 %v613_v18, %v609_v17 }
 0xe9f   :  { %617 = vrot.lane.b32.xlu0 %v615_v19, %s1090_s22 }
 0xef1   :  { %v439_v21 = vpop.permute.xlu2 %438 }
 0xef2   :  { %v1344_v22 = vadd.f32 %v439_v21, %v431_v20 }
 0xef4   :  { %1052 = vtanh.f32 %v1344_v22 }
 0xefa   :  { %v1053_v23 = vpop.eup %1052 }
 0xefb   :  { %444 = vrot.lane.b32.xlu1 %v1053_v23, %s1089_s21 }
 0xf11   :  { %v618_v25 = vpop.permute.xlu0 %617 }
 0xf12   :  { %v620_v26 = vadd.f32 %v618_v25, %v610_v24  ;;  %v574_v24 = vpop.f32.mrf.mxu3 }
 0xf13   :  { %v575_v25 = vadd.f32 %v1337_v4, %v574_v24 }
 0xf14   :  { %1054 = vtanh.f32 %v620_v26 }
 0xf1a   :  { %v1055_v27 = vpop.eup %1054 }
 0xf1b   :  { %623 = vrot.lane.b32.xlu2 %v1055_v27, %s1089_s21 }
 0xf6d   :  { %v445_v28 = vpop.permute.xlu1 %444 }
 0xf6e   :  { %v447_v29 = vmul.f32 %v445_v28, %v430_v13 }
 0xf70   :  { %449 = vrot.lane.b32.xlu0 %v447_v29, %s1090_s22 }
 0xf75   :  { %v624_v30 = vpop.permute.xlu2 %623 }
 0xf76   :  { %v626_v31 = vmul.f32 %v624_v30, %v609_v17 }
 0xf78   :  { %628 = vrot.lane.b32.xlu1 %v626_v31, %s1090_s22 }
 0xfe2   :  { %v450_v32 = vpop.permute.xlu0 %449 }
 0xfe3   :  { %452 = vst.msk [vmem:[#allocation3 + $0x30] sm:$0xff] %vm115_vm1, %v450_v32  ;;  %1001 = vmatmul.msk.f32.vlgmr.msrb.gmra.mxu2 %vm115_vm1, %v450_v32 }
 0xfe4   :  { %736 = vmatpush.msrb.mxu2 %v1296_v59 }
 0xfe6   :  { %737 = vmatpush.msrb.mxu2 %v1301_v60 }
 0xfe8   :  { %738 = vmatpush.msrb.mxu2 %v1308_v61 }
 0xfea   :  { %v629_v33 = vpop.permute.xlu1 %628  ;;  %v516_v34 = vld [vmem:[#allocation3 + $0x30] sm:$0xff]  ;;  %739 = vmatpush.msrb.mxu2 %v1315_v62 }
 0xfeb   :  { %1008 = vmatmul.msk.f32.gmra.mxu3 %vm115_vm1, %v516_v34  ;;  %1010 = vmatmul.msk.f32.vlgmr.msra.gmra.mxu2 %vm115_vm1, %v629_v33 }
 0xfec   :  { %828 = vmatpush.msra.mxu2 %v1296_v59 }
 0xfee   :  { %829 = vmatpush.msra.mxu2 %v1301_v60 }
 0xff0   :  { %830 = vmatpush.msra.mxu2 %v1308_v61 }
 0xff2   :  { %831 = vmatpush.msra.mxu2 %v1315_v62 }
0x1066   :  { %v1363_v35 = vpop.f32.mrf.mxu2 }
0x106e   :  { %v649_v38 = vpop.f32.mrf.mxu2 }
0x106f   :  { %v652_v39 = vadd.f32 %v649_v38, %v566_v37 }
0x1071   :  { %1056 = vtanh.f32 %v652_v39 }
0x1077   :  { %v1057_v40 = vpop.eup %1056 }
0x1078   :  { %658 = vrot.lane.b32.xlu2 %v1057_v40, %s1089_s21  ;;  %v654_v41 = vmul.f32 0.5, %v1057_v40 }
0x107a   :  { %v655_v42 = vadd.f32 0.5, %v654_v41  ;;  %v577_v41 = vpop.f32.mrf.mxu3 }
0x107c   :  { %v656_v46 = vmul.f32 %v655_v42, %v620_v26 }
0x10d2   :  { %v659_v43 = vpop.permute.xlu2 %658 }
0x10d3   :  { %v661_v45 = vmul.f32 %v659_v43, %v655_v42 }
0x10d5   :  { %663 = vrot.lane.b32.xlu0 %v661_v45, %s1090_s22 }
0x1147   :  { %v664_v47 = vpop.permute.xlu0 %663 }
0x1148   :  { %v666_v48 = vadd.f32 %v664_v47, %v656_v46 }
0x114a   :  { %1058 = vtanh.f32 %v666_v48 }
0x1150   :  { %v1059_v49 = vpop.eup %1058 }
0x1151   :  { %669 = vrot.lane.b32.xlu1 %v1059_v49, %s1089_s21 }
0x11c3   :  { %v670_v50 = vpop.permute.xlu1 %669 }
0x11c4   :  { %v672_v51 = vmul.f32 %v670_v50, %v655_v42  ;;  %v578_v42 = vadd.f32 %v1337_v4, %v577_v41 }
0x11c6   :  { %674 = vrot.lane.b32.xlu2 %v672_v51, %s1090_s22 }
0x1220   :  { %v675_v52 = vpop.permute.xlu2 %674 }
0x1221   :  { %1011 = vmatmul.msk.f32.vlgmr.msra.gmra.mxu1 %vm115_vm1, %v675_v52 }
0x1222   :  { %874 = vmatpush.msra.mxu1 %v1296_v59 }
0x1224   :  { %875 = vmatpush.msra.mxu1 %v1301_v60 }
0x1226   :  { %876 = vmatpush.msra.mxu1 %v1308_v61 }
0x1228   :  { %877 = vmatpush.msra.mxu1 %v1315_v62 }
0x129e   :  { %v695_v55 = vpop.f32.mrf.mxu1 }
0x129f   :  { %v698_v56 = vadd.f32 %v695_v55, %v569_v54 }
0x12a1   :  { %1060 = vtanh.f32 %v698_v56 }
0x12a7   :  { %v1061_v57 = vpop.eup %1060 }
0x12a8   :  { %704 = vrot.lane.b32.xlu0 %v1061_v57, %s1089_s21  ;;  %v700_v58 = vmul.f32 0.5, %v1061_v57 }
0x12aa   :  { %v701_v63 = vadd.f32 0.5, %v700_v58 }
0x12ac   :  { %v702_v2 = vmul.f32 %v701_v63, %v666_v48  ;;  %v113_v48 = vadd.f32 %v1196_v7, %v1286_v44 }
0x12ae   :  { %v475_v50 = vadd.f32 %v1363_v35, %v113_v48 }
0x131a   :  { %v705_v0 = vpop.permute.xlu0 %704 }
0x131b   :  { %v707_v1 = vmul.f32 %v705_v0, %v701_v63 }
0x131d   :  { %709 = vrot.lane.b32.xlu1 %v707_v1, %s1090_s22 }
0x138f   :  { %v710_v3 = vpop.permute.xlu1 %709 }
0x1390   :  { %v712_v5 = vadd.f32 %v710_v3, %v702_v2  ;;  %v580_v2 = vpop.f32.mrf.mxu3 }
0x1391   :  { %v581_v3 = vadd.f32 %v1337_v4, %v580_v2 }
0x1392   :  { %1062 = vtanh.f32 %v712_v5 }
0x1398   :  { %v1063_v6 = vpop.eup %1062 }
0x1399   :  { %715 = vrot.lane.b32.xlu2 %v1063_v6, %s1089_s21 }
0x13f3   :  { %v716_v8 = vpop.permute.xlu2 %715 }
0x13f4   :  { %v718_v9 = vmul.f32 %v716_v8, %v701_v63 }
0x13f6   :  { %720 = vrot.lane.b32.xlu0 %v718_v9, %s1090_s22 }
0x1468   :  { %v721_v10 = vpop.permute.xlu0 %720 }
0x1469   :  { %1012 = vmatmul.msk.f32.vlgmr.msrb.gmra.mxu2 %vm115_vm1, %v721_v10 }
0x146a   :  { %920 = vmatpush.msrb.mxu2 %v1296_v59 }
0x146c   :  { %921 = vmatpush.msrb.mxu2 %v1301_v60 }
0x146e   :  { %922 = vmatpush.msrb.mxu2 %v1308_v61 }
0x1470   :  { %923 = vmatpush.msrb.mxu2 %v1315_v62 }
0x14ec   :  { %v741_v13 = vpop.f32.mrf.mxu2 }
0x14ed   :  { %v744_v14 = vadd.f32 %v741_v13, %v572_v12 }
0x14ef   :  { %1064 = vtanh.f32 %v744_v14 }
0x14f5   :  { %v1065_v15 = vpop.eup %1064 }
0x14f6   :  { %750 = vrot.lane.b32.xlu1 %v1065_v15, %s1089_s21  ;;  %v746_v16 = vmul.f32 0.5, %v1065_v15 }
0x14f8   :  { %v747_v17 = vadd.f32 0.5, %v746_v16 }
0x14fa   :  { %v748_v59 = vmul.f32 %v747_v17, %v712_v5 }
0x1568   :  { %v751_v18 = vpop.permute.xlu1 %750 }
0x1569   :  { %v753_v19 = vmul.f32 %v751_v18, %v747_v17 }
0x156b   :  { %755 = vrot.lane.b32.xlu2 %v753_v19, %s1090_s22 }
0x15c5   :  { %v756_v60 = vpop.permute.xlu2 %755 }
0x15c6   :  { %v758_v61 = vadd.f32 %v756_v60, %v748_v59 }
0x15c8   :  { %1066 = vtanh.f32 %v758_v61 }
0x15ce   :  { %v1067_v62 = vpop.eup %1066 }
0x15cf   :  { %761 = vrot.lane.b32.xlu0 %v1067_v62, %s1089_s21 }
0x1641   :  { %v762_v20 = vpop.permute.xlu0 %761 }
0x1642   :  { %v764_v21 = vmul.f32 %v762_v20, %v747_v17 }
0x1644   :  { %766 = vrot.lane.b32.xlu1 %v764_v21, %s1090_s22 }
0x16b6   :  { %v767_v23 = vpop.permute.xlu1 %766 }
0x16b7   :  { %1013 = vmatmul.msk.f32.vlgmr.msrb.gmra.mxu1 %vm115_vm1, %v767_v23 }
0x1734   :  { %v787_v26 = vpop.f32.mrf.mxu1 }
0x1735   :  { %v790_v27 = vadd.f32 %v787_v26, %v575_v25 }
0x1737   :  { %1068 = vtanh.f32 %v790_v27 }
0x173d   :  { %v1069_v28 = vpop.eup %1068 }
0x173e   :  { %796 = vrot.lane.b32.xlu2 %v1069_v28, %s1089_s21  ;;  %v792_v29 = vmul.f32 0.5, %v1069_v28 }
0x1740   :  { %v793_v30 = vadd.f32 0.5, %v792_v29 }
0x1742   :  { %v794_v33 = vmul.f32 %v793_v30, %v758_v61 }
0x1798   :  { %v797_v31 = vpop.permute.xlu2 %796 }
0x1799   :  { %v799_v32 = vmul.f32 %v797_v31, %v793_v30 }
0x179b   :  { %801 = vrot.lane.b32.xlu0 %v799_v32, %s1090_s22 }
0x180d   :  { %v802_v34 = vpop.permute.xlu0 %801 }
0x180e   :  { %v804_v36 = vadd.f32 %v802_v34, %v794_v33 }
0x1810   :  { %1070 = vtanh.f32 %v804_v36 }
0x1816   :  { %v1071_v37 = vpop.eup %1070 }
0x1817   :  { %807 = vrot.lane.b32.xlu1 %v1071_v37, %s1089_s21 }
0x1889   :  { %v808_v38 = vpop.permute.xlu1 %807 }
0x188a   :  { %v810_v39 = vmul.f32 %v808_v38, %v793_v30  ;;  %v951_v38 = vld [vmem:[%s1450_s7 + $0x10] sm:$0xff] }
0x188c   :  { %812 = vrot.lane.b32.xlu2 %v810_v39, %s1090_s22  ;;  %v950_v39 = vld [vmem:[%s1450_s7 + $0x8] sm:$0xff] }
0x18e6   :  { %v813_v40 = vpop.permute.xlu2 %812 }
0x18e7   :  { %1014 = vmatmul.msk.f32.vlgmr.msra.gmra.mxu2 %vm115_vm1, %v813_v40  ;;  %v949_v40 = vld [vmem:[%s1450_s7] sm:$0xff] }
0x196a   :  { %v833_v43 = vpop.f32.mrf.mxu2 }
0x196b   :  { %v836_v45 = vadd.f32 %v833_v43, %v578_v42 }
0x196d   :  { %1072 = vtanh.f32 %v836_v45  ;;  %v1023_v45 = vld [vmem:[%s1451_s8] ss:$0 sm:$0xff] }
0x196e   :  { %1074 = vtanh.f32 %v475_v50 }
0x1973   :  { %v1073_v46 = vpop.eup %1072 }
0x1974   :  { %842 = vrot.lane.b32.xlu0 %v1073_v46, %s1089_s21  ;;  %v838_v47 = vmul.f32 0.5, %v1073_v46  ;;  %v1075_v53 = vpop.eup %1074 }
0x1975   :  { %v477_v44 = vmul.f32 0.5, %v1075_v53 }
0x1976   :  { %v839_v49 = vadd.f32 0.5, %v838_v47 }
0x1977   :  { %v478_v63 = vadd.f32 0.5, %v477_v44 }
0x1978   :  { %v840_v54 = vmul.f32 %v839_v49, %v804_v36 }
0x1979   :  { %v479_v9 = vmul.f32 %v478_v63, %v1344_v22 }
0x19e6   :  { %v843_v51 = vpop.permute.xlu0 %842 }
0x19e7   :  { %v845_v52 = vmul.f32 %v843_v51, %v839_v49 }
0x19e9   :  { %847 = vrot.lane.b32.xlu1 %v845_v52, %s1090_s22 }
0x19f1   :  { %481 = vrot.lane.b32.xlu1 %v1075_v53, %s1089_s21 }
0x1a5b   :  { %v848_v55 = vpop.permute.xlu1 %847 }
0x1a5c   :  { %v850_v56 = vadd.f32 %v848_v55, %v840_v54 }
0x1a5e   :  { %1076 = vtanh.f32 %v850_v56 }
0x1a63   :  { %v482_v35 = vpop.permute.xlu1 %481 }
0x1a64   :  { %v1077_v57 = vpop.eup %1076  ;;  %v484_v0 = vmul.f32 %v482_v35, %v478_v63 }
0x1a65   :  { %853 = vrot.lane.b32.xlu2 %v1077_v57, %s1089_s21 }
0x1abf   :  { %v854_v58 = vpop.permute.xlu2 %853 }
0x1ac0   :  { %v856_v7 = vmul.f32 %v854_v58, %v839_v49 }
0x1ac2   :  { %858 = vrot.lane.b32.xlu0 %v856_v7, %s1090_s22 }
0x1aca   :  { %486 = vrot.lane.b32.xlu0 %v484_v0, %s1090_s22 }
0x1b34   :  { %v859_v1 = vpop.permute.xlu0 %858 }
0x1b35   :  { %1015 = vmatmul.msk.f32.vlgmr.msra.gmra.mxu1 %vm115_vm1, %v859_v1 }
0x1b3c   :  { %v487_v8 = vpop.permute.xlu0 %486 }
0x1b3d   :  { %v489_v10 = vadd.f32 %v487_v8, %v479_v9 }
0x1bb2   :  { %v879_v5 = vpop.f32.mrf.mxu1 }
0x1bb3   :  { %v882_v6 = vadd.f32 %v879_v5, %v581_v3 }
0x1bb5   :  { %1078 = vtanh.f32 %v882_v6 }
0x1bb6   :  { %1080 = vtanh.f32 %v489_v10 }
0x1bbb   :  { %v1079_v11 = vpop.eup %1078 }
0x1bbc   :  { %888 = vrot.lane.b32.xlu2 %v1079_v11, %s1089_s21  ;;  %v1081_v12 = vpop.eup %1080  ;;  %v884_v13 = vmul.f32 0.5, %v1079_v11 }
0x1bbe   :  { %v885_v14 = vadd.f32 0.5, %v884_v13 }
0x1bc0   :  { %v886_v19 = vmul.f32 %v885_v14, %v850_v56 }
0x1bc4   :  { %492 = vrot.lane.b32.xlu2 %v1081_v12, %s1089_s21 }
0x1c16   :  { %v889_v15 = vpop.permute.xlu2 %888 }
0x1c17   :  { %v891_v16 = vmul.f32 %v889_v15, %v885_v14 }
0x1c19   :  { %893 = vrot.lane.b32.xlu1 %v891_v16, %s1090_s22 }
0x1c1e   :  { %v493_v17 = vpop.permute.xlu2 %492 }
0x1c1f   :  { %v495_v18 = vmul.f32 %v493_v17, %v478_v63 }
0x1c21   :  { %497 = vrot.lane.b32.xlu1 %v495_v18, %s1090_s22 }
0x1c8b   :  { %v894_v22 = vpop.permute.xlu1 %893 }
0x1c8c   :  { %v896_v59 = vadd.f32 %v894_v22, %v886_v19 }
0x1c8e   :  { %1082 = vtanh.f32 %v896_v59 }
0x1c93   :  { %v498_v60 = vpop.permute.xlu1 %497 }
0x1c94   :  { %v1083_v61 = vpop.eup %1082  ;;  %500 = vst.msk [vmem:[#allocation3 + $0x38] sm:$0xff] %vm115_vm1, %v498_v60 }
0x1c95   :  { %899 = vrot.lane.b32.xlu0 %v1083_v61, %s1089_s21 }
0x1c9b   :  { %v517_v62 = vld [vmem:[#allocation3 + $0x38] sm:$0xff] }
0x1c9c   :  { %1009 = vmatmul.msk.f32.gmra.mxu3 %vm115_vm1, %v517_v62 }
0x1d07   :  { %v900_v20 = vpop.permute.xlu0 %899 }
0x1d08   :  { %v902_v21 = vmul.f32 %v900_v20, %v885_v14 }
0x1d0a   :  { %904 = vrot.lane.b32.xlu2 %v902_v21, %s1090_s22 }
0x1d1f   :  { %v583_v24 = vpop.f32.mrf.mxu3 }
0x1d20   :  { %v584_v25 = vadd.f32 %v1337_v4, %v583_v24  ;;  %v952_v4 = vld [vmem:[%s1450_s7 + $0x18] sm:$0xff] }
0x1d21   :  { %974 = vmatpush.msrb.mxu1 %v952_v4 }
0x1d23   :  { %975 = vmatpush.msrb.mxu1 %v951_v38 }
0x1d25   :  { %976 = vmatpush.msrb.mxu1 %v950_v39 }
0x1d27   :  { %977 = vmatpush.msrb.mxu1 %v949_v40 }
0x1d64   :  { %v905_v23 = vpop.permute.xlu2 %904 }
0x1d65   :  { %1016 = vmatmul.msk.f32.vlgmr.msrb.gmra.mxu2 %vm115_vm1, %v905_v23 }
0x1de8   :  { %v925_v26 = vpop.f32.mrf.mxu2 }
0x1de9   :  { %v928_v27 = vadd.f32 %v925_v26, %v584_v25 }
0x1deb   :  { %1084 = vtanh.f32 %v928_v27 }
0x1df1   :  { %v1085_v28 = vpop.eup %1084 }
0x1df2   :  { %934 = vrot.lane.b32.xlu0 %v1085_v28, %s1089_s21  ;;  %v930_v29 = vmul.f32 0.5, %v1085_v28 }
0x1df4   :  { %v931_v30 = vadd.f32 0.5, %v930_v29 }
0x1df6   :  { %v932_v33 = vmul.f32 %v931_v30, %v896_v59 }
0x1e64   :  { %v935_v31 = vpop.permute.xlu0 %934 }
0x1e65   :  { %v937_v32 = vmul.f32 %v935_v31, %v931_v30 }
0x1e67   :  { %939 = vrot.lane.b32.xlu1 %v937_v32, %s1090_s22 }
0x1ed9   :  { %v940_v34 = vpop.permute.xlu1 %939 }
0x1eda   :  { %v942_v36 = vadd.f32 %v940_v34, %v932_v33 }
0x1edc   :  { %1086 = vtanh.f32 %v942_v36 }
0x1ee2   :  { %v1087_v37 = vpop.eup %1086 }
0x1ee3   :  { %945 = vrot.lane.b32.xlu2 %v1087_v37, %s1089_s21 }
0x1f3d   :  { %v946_v41 = vpop.permute.xlu2 %945 }
0x1f3e   :  { %v948_v42 = vmul.f32 %v946_v41, %v931_v30 }
0x1f40   :  { %958 = vrot.lane.b32.xlu0 %v948_v42, %s1090_s22 }
0x1fb2   :  { %v959_v43 = vpop.permute.xlu0 %958 }
0x1fb3   :  { %1017 = vmatmul.msk.f32.vlgmr.msrb.gmra.mxu1 %vm115_vm1, %v959_v43 }
0x2030   :  { %v979_v46 = vpop.f32.mrf.mxu1 }
0x2031   :  { %v980_v47 = vadd.f32 %v1023_v45, %v979_v46 }
0x2033   :  { %982 = vst [vmem:[%s1452_s9] sm:$0xff] %v980_v47 }

</bundles_post_ra>
